<compile_context>
chip_gen: v6e
topology: v6e:2x2x1
jax: 0.10.0
libtpu: 0.0.40
codegen_flags: <defaults>
</compile_context>

<pallas_src>
import math

import jax
import jax.numpy as jnp
from jax import lax
from jax.experimental import pallas as pl
from jax.experimental.pallas import tpu as pltpu

# ---- static model hyper-parameters (small, synthetic) ----
D = 32          # model size
H = 4           # attention heads
DK = D // H     # head dim
FF = 64         # feed-forward hidden size
K = 7           # depthwise conv kernel size (odd, non-causal, 'same' padding)
PAD = (K - 1) // 2
EPS = 1e-5
NEG = -1e30
SCALE = 1.0 / math.sqrt(DK)
VW = 128        # packed-vector row width (lane-dense)

# row indices into the packed vector table
(V_G_MAC, V_B_MAC, V_B1M, V_B2M,
 V_G_MHA, V_B_MHA, V_BQKV, V_BO,
 V_G_CV, V_B_CV, V_BP1, V_BDW, V_G_CIN, V_B_CIN, V_BP2,
 V_G_FF, V_B_FF, V_B1, V_B2, V_G_FIN, V_B_FIN,
 V_DW0) = range(22)
N_VROWS = 32    # 21 vector rows + K depthwise rows, padded to a multiple of 8


# ------------------------- shared math helpers (jnp) -------------------------
def _dot(a, b):
    return jnp.dot(a, b, preferred_element_type=jnp.float32)


def _layer_norm(x, g, b):
    mu = jnp.mean(x, axis=-1, keepdims=True)
    var = jnp.mean((x - mu) ** 2, axis=-1, keepdims=True)
    return (x - mu) * lax.rsqrt(var + EPS) * g + b


def _softmax(x):
    m = jnp.max(x, axis=-1, keepdims=True)
    e = jnp.exp(x - m)
    return e / jnp.sum(e, axis=-1, keepdims=True)


def _ffn(x, w1, b1, w2, b2):
    h = jnp.maximum(_dot(x, w1) + b1, 0.0)
    return _dot(h, w2) + b2


def _conv_module(x, mpad, shifts, wp1, bp1, dw, bdw, g_in, b_in, wp2, bp2):
    # reference-only implementation (shift-matrix depthwise conv)
    x = x * mpad
    h = _dot(x, wp1) + bp1
    x = h[:, :D] * jax.nn.sigmoid(h[:, D:])
    acc = jnp.zeros_like(x)
    for kk in range(K):
        acc = acc + _dot(shifts[kk], x) * dw[kk:kk + 1, :]
    x = acc + bdw
    x = _layer_norm(x, g_in, b_in)
    x = x * jax.nn.sigmoid(x)
    x = _dot(x, wp2) + bp2
    return x * mpad


# ------------------------------- Pallas kernel -------------------------------
def _conformer_kernel(lens_ref, x_ref, vecs_ref, wattn_ref, wffn1_ref,
                      wffn2_ref, wconv_ref, out_ref):
    g = pl.program_id(0)
    Bb, T, _ = x_ref.shape
    R = Bb * T

    x = x_ref[...].reshape(R, D)          # all Bb batch elements as one row slab
    vecs = vecs_ref[...]                  # (N_VROWS, VW) packed vectors
    w_attn = wattn_ref[...]               # (D, 4D)  [wq|wk|wv|wo]
    w_ffn1 = wffn1_ref[...]               # (D, 2*FF) [w1_macaron|w1]
    w_ffn2 = wffn2_ref[...]               # (FF, 2*D) [w2_macaron|w2]
    w_conv = wconv_ref[...]               # (D, 3*D) [wp1|wp2]

    def V(i, w=D):
        return vecs[i:i + 1, :w]          # (1, w) static slice of packed vectors

    # ---- per-batch lengths -> masks, built once from iota compares ----
    b_iota = lax.broadcasted_iota(jnp.int32, (Bb, 1, 1), 0)
    lens_b = jnp.zeros((Bb, 1, 1), jnp.int32)
    for bi in range(Bb):
        lens_b = jnp.where(b_iota == bi, lens_ref[g * Bb + bi], lens_b)
    t_row = lax.broadcasted_iota(jnp.int32, (Bb, T, 1), 1)
    row_valid_f = (t_row < lens_b).astype(jnp.float32)        # (Bb, T, 1)
    mpad = row_valid_f.reshape(R, 1)                          # (R, 1)
    row_i = lax.broadcasted_iota(jnp.int32, (Bb, T, T), 1)
    col_i = lax.broadcasted_iota(jnp.int32, (Bb, T, T), 2)
    mask3 = (row_i < lens_b) & (col_i < lens_b)               # (Bb, T, T)

    # ---- macaron feed-forward (ff_scale = 0.5) ----
    xn = _layer_norm(x, V(V_G_MAC), V(V_B_MAC))
    hid = jnp.maximum(_dot(xn, w_ffn1[:, :FF]) + V(V_B1M, FF), 0.0)
    x = x + 0.5 * (_dot(hid, w_ffn2[:, :D]) + V(V_B2M))

    # ---- multi-headed self-attention (batched over Bb per head) ----
    res = x
    xn = _layer_norm(x, V(V_G_MHA), V(V_B_MHA))
    qkv = _dot(xn, w_attn[:, :3 * D]) + V(V_BQKV, 3 * D)      # one matmul + one add
    q = qkv[:, 0 * D:1 * D]
    k = qkv[:, 1 * D:2 * D]
    v = qkv[:, 2 * D:3 * D]
    kv = qkv[:, D:3 * D]                                      # lane-adjacent cache slab

    att = jnp.zeros((R, D), jnp.float32)
    for hh in range(H):
        c0 = hh * DK
        qh = q[:, c0:c0 + DK].reshape(Bb, T, DK)
        kh = k[:, c0:c0 + DK].reshape(Bb, T, DK)
        vh = v[:, c0:c0 + DK].reshape(Bb, T, DK)
        s = jnp.einsum('bqd,bkd->bqk', qh, kh,
                       preferred_element_type=jnp.float32) * SCALE
        s = jnp.where(mask3, s, NEG)
        e = jnp.exp(s - jnp.max(s, axis=-1, keepdims=True))
        p = e / jnp.sum(e, axis=-1, keepdims=True)            # exact softmax
        p = p * row_valid_f                                   # zero padded query rows only
        oh = jnp.einsum('bqk,bkd->bqd', p, vh,
                        preferred_element_type=jnp.float32).reshape(R, DK)
        att = att + _dot(oh, w_attn[c0:c0 + DK, 3 * D:4 * D])  # fold into out-proj
    x = res + att + V(V_BO)

    # ---- convolution module (single full-slab pass) ----
    res = x
    xn = _layer_norm(x, V(V_G_CV), V(V_B_CV)) * mpad
    hcv = _dot(xn, w_conv[:, :2 * D]) + V(V_BP1, 2 * D)       # pointwise conv 1
    glu = hcv[:, :D] * jax.nn.sigmoid(hcv[:, D:2 * D])        # GLU
    acc = jnp.zeros((R, D), jnp.float32)
    t_in_b = t_row.reshape(R, 1)                              # position within batch
    for kk in range(K):                                       # depthwise conv: slab rolls
        d = kk - PAD
        keep = ((t_in_b + d >= 0) & (t_in_b + d < T)).astype(jnp.float32)
        shifted = glu if d == 0 else pltpu.roll(glu, shift=(-d) % R, axis=0)
        acc = acc + shifted * keep * V(V_DW0 + kk)
    cb = _layer_norm(acc + V(V_BDW), V(V_G_CIN), V(V_B_CIN))
    cb = cb * jax.nn.sigmoid(cb)                              # Swish
    cb = _dot(cb, w_conv[:, 2 * D:3 * D]) + V(V_BP2)          # pointwise conv 2
    x = res + cb * mpad

    # ---- feed-forward (ff_scale = 0.5) ----
    xn = _layer_norm(x, V(V_G_FF), V(V_B_FF))
    hid = jnp.maximum(_dot(xn, w_ffn1[:, FF:2 * FF]) + V(V_B1, FF), 0.0)
    x = x + 0.5 * (_dot(hid, w_ffn2[:, D:2 * D]) + V(V_B2))

    # ---- final norm + single packed (y | k | v) store ----
    y = _layer_norm(x, V(V_G_FIN), V(V_B_FIN))
    out_ref[...] = jnp.concatenate([y, kv], axis=-1).reshape(Bb, T, 3 * D)


# --------------------------- parameter packing --------------------------------
def pack_params(params):
    (g_mac, be_mac, w1m, b1m, w2m, b2m,
     g_mha, be_mha, wq, bq, wk, bk, wv, bv, wo, bo,
     g_cv, be_cv, wp1, bp1, dw, bdw, g_cin, b_cin, wp2, bp2,
     g_ff, be_ff, w1, b1, w2, b2,
     g_fin, be_fin) = params

    def row(v):
        v = v.reshape(1, -1).astype(jnp.float32)
        return jnp.pad(v, ((0, 0), (0, VW - v.shape[1])))

    b_qkv = jnp.concatenate([bq, bk, bv], axis=1)            # (1, 3D)
    rows = [g_mac, be_mac, b1m, b2m,
            g_mha, be_mha, b_qkv, bo,
            g_cv, be_cv, bp1, bdw, g_cin, b_cin, bp2,
            g_ff, be_ff, b1, b2, g_fin, be_fin]
    rows += [dw[kk:kk + 1, :] for kk in range(K)]            # depthwise taps as rows
    vecs = jnp.concatenate([row(v) for v in rows], axis=0)
    vecs = jnp.pad(vecs, ((0, N_VROWS - vecs.shape[0]), (0, 0)))

    w_attn = jnp.concatenate([wq, wk, wv, wo], axis=1)       # (D, 4D)
    w_ffn1 = jnp.concatenate([w1m, w1], axis=1)              # (D, 2*FF)
    w_ffn2 = jnp.concatenate([w2m, w2], axis=1)              # (FF, 2*D)
    w_conv = jnp.concatenate([wp1, wp2], axis=1)             # (D, 3*D)
    return vecs, w_attn, w_ffn1, w_ffn2, w_conv


# ------------------------------- wrapper --------------------------------------
def conformer_layer(x, mask, pos_emb, mask_pad, params, block_b=None):
    """x: (B,T,D) f32; mask: (B,T,T) bool; mask_pad: (B,1,T) bool; pos_emb unused.

    block_b: batch elements per grid step.  Default B (one fat step; best for
    single-TC v5e/v6e).  Pass block_b=B//2 on v7x so the ("parallel",) grid axis
    shards across its two TensorCores, and use 2-4 steps once B*T is large so
    BlockSpec double-buffering overlaps the x-in / packed-out DMAs with compute.
    """
    del pos_emb
    B, T, _ = x.shape
    lengths = jnp.sum(mask_pad[:, 0, :].astype(jnp.int32), axis=-1)   # (B,)

    Bb = B if block_b is None else block_b
    assert B % Bb == 0
    grid = (B // Bb,)

    vecs, w_attn, w_ffn1, w_ffn2, w_conv = pack_params(params)

    def const_spec(a):
        nd = a.ndim
        return pl.BlockSpec(a.shape, lambda g, lens, nd=nd: (0,) * nd)

    grid_spec = pltpu.PrefetchScalarGridSpec(
        num_scalar_prefetch=1,
        grid=grid,
        in_specs=[
            pl.BlockSpec((Bb, T, D), lambda g, lens: (g, 0, 0)),      # x
            const_spec(vecs), const_spec(w_attn), const_spec(w_ffn1),
            const_spec(w_ffn2), const_spec(w_conv),
        ],
        out_specs=pl.BlockSpec((Bb, T, 3 * D), lambda g, lens: (g, 0, 0)),
    )

    out = pl.pallas_call(
        _conformer_kernel,
        out_shape=jax.ShapeDtypeStruct((B, T, 3 * D), jnp.float32),
        grid_spec=grid_spec,
        compiler_params=pltpu.CompilerParams(
            dimension_semantics=("parallel",)),
    )(lengths, x, vecs, w_attn, w_ffn1, w_ffn2, w_conv)

    # split packed slab: y | lane-dense kv cache -> (B, H, T, 2*DK) in XLA
    y = out[:, :, :D]
    kv = out[:, :, D:]
    k_h = kv[:, :, :D].reshape(B, T, H, DK).transpose(0, 2, 1, 3)
    v_h = kv[:, :, D:].reshape(B, T, H, DK).transpose(0, 2, 1, 3)
    att_cache = jnp.concatenate([k_h, v_h], axis=-1)

    new_cnn_cache = jnp.zeros((0, 0, 0), dtype=x.dtype)   # non-causal conv module
    return y, mask, att_cache, new_cnn_cache


# --------------------------- deterministic params -----------------------------
def make_params(key):
    ks = jax.random.split(key, 12)

    def dense(k, din, dout):
        kw, kb = jax.random.split(k)
        w = jax.random.normal(kw, (din, dout), jnp.float32) / jnp.sqrt(din)
        b = 0.02 * jax.random.normal(kb, (1, dout), jnp.float32)
        return w, b

    ones = jnp.ones((1, D), jnp.float32)
    zeros = jnp.zeros((1, D), jnp.float32)

    p = []
    p += [ones, zeros]                                       # norm_ff_macaron
    w1m, b1m = dense(ks[0], D, FF); w2m, b2m = dense(ks[1], FF, D)
    p += [w1m, b1m, w2m, b2m]                                # macaron FFN
    p += [ones, zeros]                                       # norm_mha
    wq, bq = dense(ks[2], D, D); wk, bk = dense(ks[3], D, D)
    wv, bv = dense(ks[4], D, D); wo, bo = dense(ks[5], D, D)
    p += [wq, bq, wk, bk, wv, bv, wo, bo]                    # attention
    p += [ones, zeros]                                       # norm_conv
    wp1, bp1 = dense(ks[6], D, 2 * D)
    dw = jax.random.normal(ks[7], (K, D), jnp.float32) / jnp.sqrt(K)
    bdw = 0.02 * jax.random.normal(ks[8], (1, D), jnp.float32)
    wp2, bp2 = dense(ks[9], D, D)
    p += [wp1, bp1, dw, bdw, ones, zeros, wp2, bp2]          # conv module
    p += [ones, zeros]                                       # norm_ff
    w1, b1 = dense(ks[10], D, FF); w2, b2 = dense(ks[11], FF, D)
    p += [w1, b1, w2, b2]                                    # FFN
    p += [ones, zeros]                                       # norm_final
    return p


# ------------------------------ pure-JAX reference ----------------------------
def reference_forward(x, maskf, mpadf, shifts, params):
    (g_mac, be_mac, w1m, b1m, w2m, b2m,
     g_mha, be_mha, wq, bq, wk, bk, wv, bv, wo, bo,
     g_cv, be_cv, wp1, bp1, dw, bdw, g_cin, b_cin, wp2, bp2,
     g_ff, be_ff, w1, b1, w2, b2,
     g_fin, be_fin) = params

    def single(xb, mb, mpb):
        x = xb
        x = x + 0.5 * _ffn(_layer_norm(x, g_mac, be_mac), w1m, b1m, w2m, b2m)
        res = x
        xn = _layer_norm(x, g_mha, be_mha)
        q = _dot(xn, wq) + bq
        k = _dot(xn, wk) + bk
        v = _dot(xn, wv) + bv
        att = jnp.zeros_like(xn)
        caches = []
        for h in range(H):
            qh = q[:, h * DK:(h + 1) * DK]
            kh = k[:, h * DK:(h + 1) * DK]
            vh = v[:, h * DK:(h + 1) * DK]
            s = lax.dot_general(qh, kh, (((1,), (1,)), ((), ())),
                                preferred_element_type=jnp.float32) * SCALE
            s = jnp.where(mb > 0.5, s, NEG)
            p = _softmax(s)
            p = jnp.where(mb > 0.5, p, 0.0)
            att = att + _dot(_dot(p, vh), wo[h * DK:(h + 1) * DK, :])
            caches.append(jnp.concatenate([kh, vh], axis=-1))
        x = res + att + bo
        x = x + _conv_module(_layer_norm(x, g_cv, be_cv), mpb, shifts,
                             wp1, bp1, dw, bdw, g_cin, b_cin, wp2, bp2)
        x = x + 0.5 * _ffn(_layer_norm(x, g_ff, be_ff), w1, b1, w2, b2)
        x = _layer_norm(x, g_fin, be_fin)
        return x, jnp.stack(caches, axis=0)

    return jax.vmap(single)(x, maskf, mpadf)


# ----------------------------------- main --------------------------------------
if __name__ == "__main__":
    B, T = 2, 8
    key = jax.random.PRNGKey(0)
    kx, kp = jax.random.split(key)

    x = jax.random.normal(kx, (B, T, D), jnp.float32)
    pos_emb = jnp.zeros((1, T, D), jnp.float32)          # unused (plain MHA)
    lengths = jnp.array([T, T - 2])
    valid = jnp.arange(T)[None, :] < lengths[:, None]    # (B, T)
    mask = valid[:, None, :] & valid[:, :, None]         # (B, T, T) bool
    mask_pad = valid[:, None, :]                         # (B, 1, T) bool
    params = make_params(kp)

    y, out_mask, att_cache, cnn_cache = conformer_layer(x, mask, pos_emb, mask_pad, params)
    jax.block_until_ready((y, att_cache))

    # correctness check against an independent pure-JAX reference
    t_idx = jnp.arange(T)
    shifts = jnp.stack(
        [(t_idx[:, None] + (kk - PAD) == t_idx[None, :]).astype(jnp.float32)
         for kk in range(K)], axis=0)
    maskf = mask.astype(jnp.float32)
    mpadf = jnp.transpose(mask_pad.astype(jnp.float32), (0, 2, 1))
    y_ref, cache_ref = reference_forward(x, maskf, mpadf, shifts, params)

    assert y.shape == (B, T, D)
    assert att_cache.shape == (B, H, T, 2 * DK)
    assert cnn_cache.shape == (0, 0, 0)
    assert jnp.allclose(att_cache, cache_ref, atol=1e-3, rtol=1e-3)
    assert jnp.allclose(y, y_ref, atol=1e-3, rtol=1e-3)   # exact softmax now
    print("KERNEL_OK")
</pallas_src>

<mosaic_0001>
module attributes {stable_mosaic.version = 11 : i64} {
  func.func @_conformer_kernel(%arg0: i32, %arg1: memref<2xi32, #tpu.memory_space<smem>>, %arg2: memref<2x8x32xf32, #tpu.memory_space<vmem>>, %arg3: memref<32x128xf32, #tpu.memory_space<vmem>>, %arg4: memref<32x128xf32, #tpu.memory_space<vmem>>, %arg5: memref<32x128xf32, #tpu.memory_space<vmem>>, %arg6: memref<64x64xf32, #tpu.memory_space<vmem>>, %arg7: memref<32x96xf32, #tpu.memory_space<vmem>>, %arg8: memref<2x8x96xf32, #tpu.memory_space<vmem>>) attributes {dimension_semantics = [#tpu.dimension_semantics<parallel>], iteration_bounds = array<i64: 1>, scalar_prefetch = 1 : i64, scratch_operands = 0 : i64, tpu.core_type = #tpu.core_type<tc>, window_params = [{transform_indices = @transform_0, window_bounds = array<i64: 2, 8, 32>}, {pipeline_mode = #tpu.pipeline_mode<synchronous>, transform_indices = @transform_1, window_bounds = array<i64: 32, 128>}, {pipeline_mode = #tpu.pipeline_mode<synchronous>, transform_indices = @transform_2, window_bounds = array<i64: 32, 128>}, {pipeline_mode = #tpu.pipeline_mode<synchronous>, transform_indices = @transform_3, window_bounds = array<i64: 32, 128>}, {pipeline_mode = #tpu.pipeline_mode<synchronous>, transform_indices = @transform_4, window_bounds = array<i64: 64, 64>}, {pipeline_mode = #tpu.pipeline_mode<synchronous>, transform_indices = @transform_5, window_bounds = array<i64: 32, 96>}, {transform_indices = @transform_6, window_bounds = array<i64: 2, 8, 96>}]} {
    %c0 = arith.constant 0 : index
    %c0_0 = arith.constant 0 : index
    %c0_1 = arith.constant 0 : index
    %0 = vector.load %arg2[%c0, %c0_0, %c0_1] : memref<2x8x32xf32, #tpu.memory_space<vmem>>, vector<2x8x32xf32>
    %1 = vector.shape_cast %0 : vector<2x8x32xf32> to vector<16x32xf32>
    %c0_2 = arith.constant 0 : index
    %c0_3 = arith.constant 0 : index
    %2 = vector.load %arg3[%c0_2, %c0_3] : memref<32x128xf32, #tpu.memory_space<vmem>>, vector<32x128xf32>
    %c0_4 = arith.constant 0 : index
    %c0_5 = arith.constant 0 : index
    %3 = vector.load %arg4[%c0_4, %c0_5] : memref<32x128xf32, #tpu.memory_space<vmem>>, vector<32x128xf32>
    %c0_6 = arith.constant 0 : index
    %c0_7 = arith.constant 0 : index
    %4 = vector.load %arg5[%c0_6, %c0_7] : memref<32x128xf32, #tpu.memory_space<vmem>>, vector<32x128xf32>
    %c0_8 = arith.constant 0 : index
    %c0_9 = arith.constant 0 : index
    %5 = vector.load %arg6[%c0_8, %c0_9] : memref<64x64xf32, #tpu.memory_space<vmem>>, vector<64x64xf32>
    %c0_10 = arith.constant 0 : index
    %c0_11 = arith.constant 0 : index
    %6 = vector.load %arg7[%c0_10, %c0_11] : memref<32x96xf32, #tpu.memory_space<vmem>>, vector<32x96xf32>
    %7 = tpu.iota {dimensions = array<i32: 0>} : vector<2x1x1xi32>
    %c0_i32 = arith.constant 0 : i32
    %8 = vector.broadcast %c0_i32 : i32 to vector<2x1x1xi32>
    %c0_i32_12 = arith.constant 0 : i32
    %9 = vector.broadcast %c0_i32_12 : i32 to vector<2x1x1xi32>
    %10 = arith.cmpi eq, %7, %9 : vector<2x1x1xi32>
    %c2_i32 = arith.constant 2 : i32
    %11 = arith.muli %arg0, %c2_i32 : i32
    %c0_i32_13 = arith.constant 0 : i32
    %12 = arith.addi %11, %c0_i32_13 : i32
    %13 = arith.index_cast %12 : i32 to index
    %14 = memref.load %arg1[%13] : memref<2xi32, #tpu.memory_space<smem>>
    %15 = vector.broadcast %14 : i32 to vector<2x1x1xi32>
    %16 = arith.select %10, %15, %8 : vector<2x1x1xi1>, vector<2x1x1xi32>
    %c1_i32 = arith.constant 1 : i32
    %17 = vector.broadcast %c1_i32 : i32 to vector<2x1x1xi32>
    %18 = arith.cmpi eq, %7, %17 : vector<2x1x1xi32>
    %c2_i32_14 = arith.constant 2 : i32
    %19 = arith.muli %arg0, %c2_i32_14 : i32
    %c1_i32_15 = arith.constant 1 : i32
    %20 = arith.addi %19, %c1_i32_15 : i32
    %21 = arith.index_cast %20 : i32 to index
    %22 = memref.load %arg1[%21] : memref<2xi32, #tpu.memory_space<smem>>
    %23 = vector.broadcast %22 : i32 to vector<2x1x1xi32>
    %24 = arith.select %18, %23, %16 : vector<2x1x1xi1>, vector<2x1x1xi32>
    %25 = tpu.iota {dimensions = array<i32: 1>} : vector<2x8x1xi32>
    %26 = vector.broadcast %24 : vector<2x1x1xi32> to vector<2x8x1xi32>
    %27 = arith.cmpi slt, %25, %26 : vector<2x8x1xi32>
    %28 = arith.extui %27 : vector<2x8x1xi1> to vector<2x8x1xi32>
    %29 = arith.sitofp %28 : vector<2x8x1xi32> to vector<2x8x1xf32>
    %30 = vector.shape_cast %29 : vector<2x8x1xf32> to vector<16x1xf32>
    %31 = tpu.iota {dimensions = array<i32: 1>} : vector<2x8x8xi32>
    %32 = tpu.iota {dimensions = array<i32: 2>} : vector<2x8x8xi32>
    %33 = vector.broadcast %24 : vector<2x1x1xi32> to vector<2x8x8xi32>
    %34 = arith.cmpi slt, %31, %33 : vector<2x8x8xi32>
    %35 = vector.broadcast %24 : vector<2x1x1xi32> to vector<2x8x8xi32>
    %36 = arith.cmpi slt, %32, %35 : vector<2x8x8xi32>
    %37 = arith.andi %34, %36 : vector<2x8x8xi1>
    %38 = vector.extract_strided_slice %2 {offsets = [0, 0], sizes = [1, 32], strides = [1, 1]} : vector<32x128xf32> to vector<1x32xf32>
    %39 = vector.extract_strided_slice %2 {offsets = [1, 0], sizes = [1, 32], strides = [1, 1]} : vector<32x128xf32> to vector<1x32xf32>
    %cst = arith.constant dense<0.000000e+00> : vector<16xf32>
    %40 = vector.multi_reduction <add>, %1, %cst [1] : vector<16x32xf32> to vector<16xf32>
    %41 = vector.shape_cast %40 : vector<16xf32> to vector<16x1xf32>
    %cst_16 = arith.constant 3.200000e+01 : f32
    %42 = vector.broadcast %cst_16 : f32 to vector<16x1xf32>
    %43 = arith.divf %41, %42 : vector<16x1xf32>
    %44 = vector.broadcast %43 : vector<16x1xf32> to vector<16x32xf32>
    %45 = arith.subf %1, %44 : vector<16x32xf32>
    %46 = arith.mulf %45, %45 : vector<16x32xf32>
    %cst_17 = arith.constant dense<0.000000e+00> : vector<16xf32>
    %47 = vector.multi_reduction <add>, %46, %cst_17 [1] : vector<16x32xf32> to vector<16xf32>
    %48 = vector.shape_cast %47 : vector<16xf32> to vector<16x1xf32>
    %cst_18 = arith.constant 3.200000e+01 : f32
    %49 = vector.broadcast %cst_18 : f32 to vector<16x1xf32>
    %50 = arith.divf %48, %49 : vector<16x1xf32>
    %51 = vector.broadcast %43 : vector<16x1xf32> to vector<16x32xf32>
    %52 = arith.subf %1, %51 : vector<16x32xf32>
    %cst_19 = arith.constant 9.99999974E-6 : f32
    %53 = vector.broadcast %cst_19 : f32 to vector<16x1xf32>
    %54 = arith.addf %50, %53 : vector<16x1xf32>
    %55 = math.rsqrt %54 : vector<16x1xf32>
    %56 = vector.broadcast %55 : vector<16x1xf32> to vector<16x32xf32>
    %57 = arith.mulf %52, %56 : vector<16x32xf32>
    %58 = vector.broadcast %38 : vector<1x32xf32> to vector<16x32xf32>
    %59 = arith.mulf %57, %58 : vector<16x32xf32>
    %60 = vector.broadcast %39 : vector<1x32xf32> to vector<16x32xf32>
    %61 = arith.addf %59, %60 : vector<16x32xf32>
    %62 = vector.extract_strided_slice %4 {offsets = [0, 0], sizes = [32, 64], strides = [1, 1]} : vector<32x128xf32> to vector<32x64xf32>
    %cst_20 = arith.constant dense<0.000000e+00> : vector<16x64xf32>
    %63 = tpu.matmul %61, %62, %cst_20 {dimension_numbers = #tpu.dot_dimension_numbers<[1], [0], [0], [1], [0, 0, 1, 1], [], []>} : vector<16x32xf32>, vector<32x64xf32>, vector<16x64xf32> -> vector<16x64xf32>
    %64 = vector.extract_strided_slice %2 {offsets = [2, 0], sizes = [1, 64], strides = [1, 1]} : vector<32x128xf32> to vector<1x64xf32>
    %65 = vector.broadcast %64 : vector<1x64xf32> to vector<16x64xf32>
    %66 = arith.addf %63, %65 : vector<16x64xf32>
    %cst_21 = arith.constant 0.000000e+00 : f32
    %67 = vector.broadcast %cst_21 : f32 to vector<16x64xf32>
    %68 = arith.maximumf %66, %67 : vector<16x64xf32>
    %69 = vector.extract_strided_slice %5 {offsets = [0, 0], sizes = [64, 32], strides = [1, 1]} : vector<64x64xf32> to vector<64x32xf32>
    %cst_22 = arith.constant dense<0.000000e+00> : vector<16x32xf32>
    %70 = tpu.matmul %68, %69, %cst_22 {dimension_numbers = #tpu.dot_dimension_numbers<[1], [0], [0], [1], [0, 0, 1, 1], [], []>} : vector<16x64xf32>, vector<64x32xf32>, vector<16x32xf32> -> vector<16x32xf32>
    %71 = vector.extract_strided_slice %2 {offsets = [3, 0], sizes = [1, 32], strides = [1, 1]} : vector<32x128xf32> to vector<1x32xf32>
    %72 = vector.broadcast %71 : vector<1x32xf32> to vector<16x32xf32>
    %73 = arith.addf %70, %72 : vector<16x32xf32>
    %cst_23 = arith.constant 5.000000e-01 : f32
    %74 = vector.broadcast %cst_23 : f32 to vector<16x32xf32>
    %75 = arith.mulf %74, %73 : vector<16x32xf32>
    %76 = arith.addf %1, %75 : vector<16x32xf32>
    %77 = vector.extract_strided_slice %2 {offsets = [4, 0], sizes = [1, 32], strides = [1, 1]} : vector<32x128xf32> to vector<1x32xf32>
    %78 = vector.extract_strided_slice %2 {offsets = [5, 0], sizes = [1, 32], strides = [1, 1]} : vector<32x128xf32> to vector<1x32xf32>
    %cst_24 = arith.constant dense<0.000000e+00> : vector<16xf32>
    %79 = vector.multi_reduction <add>, %76, %cst_24 [1] : vector<16x32xf32> to vector<16xf32>
    %80 = vector.shape_cast %79 : vector<16xf32> to vector<16x1xf32>
    %cst_25 = arith.constant 3.200000e+01 : f32
    %81 = vector.broadcast %cst_25 : f32 to vector<16x1xf32>
    %82 = arith.divf %80, %81 : vector<16x1xf32>
    %83 = vector.broadcast %82 : vector<16x1xf32> to vector<16x32xf32>
    %84 = arith.subf %76, %83 : vector<16x32xf32>
    %85 = arith.mulf %84, %84 : vector<16x32xf32>
    %cst_26 = arith.constant dense<0.000000e+00> : vector<16xf32>
    %86 = vector.multi_reduction <add>, %85, %cst_26 [1] : vector<16x32xf32> to vector<16xf32>
    %87 = vector.shape_cast %86 : vector<16xf32> to vector<16x1xf32>
    %cst_27 = arith.constant 3.200000e+01 : f32
    %88 = vector.broadcast %cst_27 : f32 to vector<16x1xf32>
    %89 = arith.divf %87, %88 : vector<16x1xf32>
    %90 = vector.broadcast %82 : vector<16x1xf32> to vector<16x32xf32>
    %91 = arith.subf %76, %90 : vector<16x32xf32>
    %cst_28 = arith.constant 9.99999974E-6 : f32
    %92 = vector.broadcast %cst_28 : f32 to vector<16x1xf32>
    %93 = arith.addf %89, %92 : vector<16x1xf32>
    %94 = math.rsqrt %93 : vector<16x1xf32>
    %95 = vector.broadcast %94 : vector<16x1xf32> to vector<16x32xf32>
    %96 = arith.mulf %91, %95 : vector<16x32xf32>
    %97 = vector.broadcast %77 : vector<1x32xf32> to vector<16x32xf32>
    %98 = arith.mulf %96, %97 : vector<16x32xf32>
    %99 = vector.broadcast %78 : vector<1x32xf32> to vector<16x32xf32>
    %100 = arith.addf %98, %99 : vector<16x32xf32>
    %101 = vector.extract_strided_slice %3 {offsets = [0, 0], sizes = [32, 96], strides = [1, 1]} : vector<32x128xf32> to vector<32x96xf32>
    %cst_29 = arith.constant dense<0.000000e+00> : vector<16x96xf32>
    %102 = tpu.matmul %100, %101, %cst_29 {dimension_numbers = #tpu.dot_dimension_numbers<[1], [0], [0], [1], [0, 0, 1, 1], [], []>} : vector<16x32xf32>, vector<32x96xf32>, vector<16x96xf32> -> vector<16x96xf32>
    %103 = vector.extract_strided_slice %2 {offsets = [6, 0], sizes = [1, 96], strides = [1, 1]} : vector<32x128xf32> to vector<1x96xf32>
    %104 = vector.broadcast %103 : vector<1x96xf32> to vector<16x96xf32>
    %105 = arith.addf %102, %104 : vector<16x96xf32>
    %106 = vector.extract_strided_slice %105 {offsets = [0, 0], sizes = [16, 32], strides = [1, 1]} : vector<16x96xf32> to vector<16x32xf32>
    %107 = vector.extract_strided_slice %105 {offsets = [0, 32], sizes = [16, 32], strides = [1, 1]} : vector<16x96xf32> to vector<16x32xf32>
    %108 = vector.extract_strided_slice %105 {offsets = [0, 64], sizes = [16, 32], strides = [1, 1]} : vector<16x96xf32> to vector<16x32xf32>
    %109 = vector.extract_strided_slice %105 {offsets = [0, 32], sizes = [16, 64], strides = [1, 1]} : vector<16x96xf32> to vector<16x64xf32>
    %cst_30 = arith.constant 0.000000e+00 : f32
    %110 = vector.broadcast %cst_30 : f32 to vector<16x32xf32>
    %111 = vector.extract_strided_slice %106 {offsets = [0, 0], sizes = [16, 8], strides = [1, 1]} : vector<16x32xf32> to vector<16x8xf32>
    %112 = vector.shape_cast %111 : vector<16x8xf32> to vector<2x8x8xf32>
    %113 = vector.extract_strided_slice %107 {offsets = [0, 0], sizes = [16, 8], strides = [1, 1]} : vector<16x32xf32> to vector<16x8xf32>
    %114 = vector.shape_cast %113 : vector<16x8xf32> to vector<2x8x8xf32>
    %115 = vector.extract_strided_slice %108 {offsets = [0, 0], sizes = [16, 8], strides = [1, 1]} : vector<16x32xf32> to vector<16x8xf32>
    %116 = vector.shape_cast %115 : vector<16x8xf32> to vector<2x8x8xf32>
    "tpu.trace_start"() <{level = 10 : i32, message = "bqd,bkd->bqk"}> : () -> ()
    %cst_31 = arith.constant dense<0.000000e+00> : vector<2x8x8xf32>
    %117 = tpu.matmul %112, %114, %cst_31 {dimension_numbers = #tpu.dot_dimension_numbers<[2], [2], [1], [1], [0, 0, 0, 1, 1, 1], [0], [0]>} : vector<2x8x8xf32>, vector<2x8x8xf32>, vector<2x8x8xf32> -> vector<2x8x8xf32>
    "tpu.trace_stop"() : () -> ()
    %cst_32 = arith.constant 0.353553385 : f32
    %118 = vector.broadcast %cst_32 : f32 to vector<2x8x8xf32>
    %119 = arith.mulf %117, %118 : vector<2x8x8xf32>
    %cst_33 = arith.constant -1.000000e+30 : f32
    %120 = vector.broadcast %cst_33 : f32 to vector<2x8x8xf32>
    %121 = arith.select %37, %119, %120 : vector<2x8x8xi1>, vector<2x8x8xf32>
    %cst_34 = arith.constant dense<0xFF800000> : vector<2x8xf32>
    %122 = vector.multi_reduction <maximumf>, %121, %cst_34 [2] : vector<2x8x8xf32> to vector<2x8xf32>
    %123 = vector.shape_cast %122 : vector<2x8xf32> to vector<2x8x1xf32>
    %124 = vector.broadcast %123 : vector<2x8x1xf32> to vector<2x8x8xf32>
    %125 = arith.subf %121, %124 : vector<2x8x8xf32>
    %126 = math.exp %125 : vector<2x8x8xf32>
    %cst_35 = arith.constant dense<0.000000e+00> : vector<2x8xf32>
    %127 = vector.multi_reduction <add>, %126, %cst_35 [2] : vector<2x8x8xf32> to vector<2x8xf32>
    %128 = vector.shape_cast %127 : vector<2x8xf32> to vector<2x8x1xf32>
    %129 = vector.broadcast %128 : vector<2x8x1xf32> to vector<2x8x8xf32>
    %130 = arith.divf %126, %129 : vector<2x8x8xf32>
    %131 = vector.broadcast %29 : vector<2x8x1xf32> to vector<2x8x8xf32>
    %132 = arith.mulf %130, %131 : vector<2x8x8xf32>
    "tpu.trace_start"() <{level = 10 : i32, message = "bqk,bkd->bqd"}> : () -> ()
    %cst_36 = arith.constant dense<0.000000e+00> : vector<2x8x8xf32>
    %133 = tpu.matmul %132, %116, %cst_36 {dimension_numbers = #tpu.dot_dimension_numbers<[2], [1], [1], [2], [0, 0, 0, 1, 1, 2], [0], [0]>} : vector<2x8x8xf32>, vector<2x8x8xf32>, vector<2x8x8xf32> -> vector<2x8x8xf32>
    "tpu.trace_stop"() : () -> ()
    %134 = vector.shape_cast %133 : vector<2x8x8xf32> to vector<16x8xf32>
    %135 = vector.extract_strided_slice %3 {offsets = [0, 96], sizes = [8, 32], strides = [1, 1]} : vector<32x128xf32> to vector<8x32xf32>
    %cst_37 = arith.constant dense<0.000000e+00> : vector<16x32xf32>
    %136 = tpu.matmul %134, %135, %cst_37 {dimension_numbers = #tpu.dot_dimension_numbers<[1], [0], [0], [1], [0, 0, 1, 1], [], []>} : vector<16x8xf32>, vector<8x32xf32>, vector<16x32xf32> -> vector<16x32xf32>
    %137 = arith.addf %110, %136 : vector<16x32xf32>
    %138 = vector.extract_strided_slice %106 {offsets = [0, 8], sizes = [16, 8], strides = [1, 1]} : vector<16x32xf32> to vector<16x8xf32>
    %139 = vector.shape_cast %138 : vector<16x8xf32> to vector<2x8x8xf32>
    %140 = vector.extract_strided_slice %107 {offsets = [0, 8], sizes = [16, 8], strides = [1, 1]} : vector<16x32xf32> to vector<16x8xf32>
    %141 = vector.shape_cast %140 : vector<16x8xf32> to vector<2x8x8xf32>
    %142 = vector.extract_strided_slice %108 {offsets = [0, 8], sizes = [16, 8], strides = [1, 1]} : vector<16x32xf32> to vector<16x8xf32>
    %143 = vector.shape_cast %142 : vector<16x8xf32> to vector<2x8x8xf32>
    "tpu.trace_start"() <{level = 10 : i32, message = "bqd,bkd->bqk"}> : () -> ()
    %cst_38 = arith.constant dense<0.000000e+00> : vector<2x8x8xf32>
    %144 = tpu.matmul %139, %141, %cst_38 {dimension_numbers = #tpu.dot_dimension_numbers<[2], [2], [1], [1], [0, 0, 0, 1, 1, 1], [0], [0]>} : vector<2x8x8xf32>, vector<2x8x8xf32>, vector<2x8x8xf32> -> vector<2x8x8xf32>
    "tpu.trace_stop"() : () -> ()
    %cst_39 = arith.constant 0.353553385 : f32
    %145 = vector.broadcast %cst_39 : f32 to vector<2x8x8xf32>
    %146 = arith.mulf %144, %145 : vector<2x8x8xf32>
    %cst_40 = arith.constant -1.000000e+30 : f32
    %147 = vector.broadcast %cst_40 : f32 to vector<2x8x8xf32>
    %148 = arith.select %37, %146, %147 : vector<2x8x8xi1>, vector<2x8x8xf32>
    %cst_41 = arith.constant dense<0xFF800000> : vector<2x8xf32>
    %149 = vector.multi_reduction <maximumf>, %148, %cst_41 [2] : vector<2x8x8xf32> to vector<2x8xf32>
    %150 = vector.shape_cast %149 : vector<2x8xf32> to vector<2x8x1xf32>
    %151 = vector.broadcast %150 : vector<2x8x1xf32> to vector<2x8x8xf32>
    %152 = arith.subf %148, %151 : vector<2x8x8xf32>
    %153 = math.exp %152 : vector<2x8x8xf32>
    %cst_42 = arith.constant dense<0.000000e+00> : vector<2x8xf32>
    %154 = vector.multi_reduction <add>, %153, %cst_42 [2] : vector<2x8x8xf32> to vector<2x8xf32>
    %155 = vector.shape_cast %154 : vector<2x8xf32> to vector<2x8x1xf32>
    %156 = vector.broadcast %155 : vector<2x8x1xf32> to vector<2x8x8xf32>
    %157 = arith.divf %153, %156 : vector<2x8x8xf32>
    %158 = vector.broadcast %29 : vector<2x8x1xf32> to vector<2x8x8xf32>
    %159 = arith.mulf %157, %158 : vector<2x8x8xf32>
    "tpu.trace_start"() <{level = 10 : i32, message = "bqk,bkd->bqd"}> : () -> ()
    %cst_43 = arith.constant dense<0.000000e+00> : vector<2x8x8xf32>
    %160 = tpu.matmul %159, %143, %cst_43 {dimension_numbers = #tpu.dot_dimension_numbers<[2], [1], [1], [2], [0, 0, 0, 1, 1, 2], [0], [0]>} : vector<2x8x8xf32>, vector<2x8x8xf32>, vector<2x8x8xf32> -> vector<2x8x8xf32>
    "tpu.trace_stop"() : () -> ()
    %161 = vector.shape_cast %160 : vector<2x8x8xf32> to vector<16x8xf32>
    %162 = vector.extract_strided_slice %3 {offsets = [8, 96], sizes = [8, 32], strides = [1, 1]} : vector<32x128xf32> to vector<8x32xf32>
    %cst_44 = arith.constant dense<0.000000e+00> : vector<16x32xf32>
    %163 = tpu.matmul %161, %162, %cst_44 {dimension_numbers = #tpu.dot_dimension_numbers<[1], [0], [0], [1], [0, 0, 1, 1], [], []>} : vector<16x8xf32>, vector<8x32xf32>, vector<16x32xf32> -> vector<16x32xf32>
    %164 = arith.addf %137, %163 : vector<16x32xf32>
    %165 = vector.extract_strided_slice %106 {offsets = [0, 16], sizes = [16, 8], strides = [1, 1]} : vector<16x32xf32> to vector<16x8xf32>
    %166 = vector.shape_cast %165 : vector<16x8xf32> to vector<2x8x8xf32>
    %167 = vector.extract_strided_slice %107 {offsets = [0, 16], sizes = [16, 8], strides = [1, 1]} : vector<16x32xf32> to vector<16x8xf32>
    %168 = vector.shape_cast %167 : vector<16x8xf32> to vector<2x8x8xf32>
    %169 = vector.extract_strided_slice %108 {offsets = [0, 16], sizes = [16, 8], strides = [1, 1]} : vector<16x32xf32> to vector<16x8xf32>
    %170 = vector.shape_cast %169 : vector<16x8xf32> to vector<2x8x8xf32>
    "tpu.trace_start"() <{level = 10 : i32, message = "bqd,bkd->bqk"}> : () -> ()
    %cst_45 = arith.constant dense<0.000000e+00> : vector<2x8x8xf32>
    %171 = tpu.matmul %166, %168, %cst_45 {dimension_numbers = #tpu.dot_dimension_numbers<[2], [2], [1], [1], [0, 0, 0, 1, 1, 1], [0], [0]>} : vector<2x8x8xf32>, vector<2x8x8xf32>, vector<2x8x8xf32> -> vector<2x8x8xf32>
    "tpu.trace_stop"() : () -> ()
    %cst_46 = arith.constant 0.353553385 : f32
    %172 = vector.broadcast %cst_46 : f32 to vector<2x8x8xf32>
    %173 = arith.mulf %171, %172 : vector<2x8x8xf32>
    %cst_47 = arith.constant -1.000000e+30 : f32
    %174 = vector.broadcast %cst_47 : f32 to vector<2x8x8xf32>
    %175 = arith.select %37, %173, %174 : vector<2x8x8xi1>, vector<2x8x8xf32>
    %cst_48 = arith.constant dense<0xFF800000> : vector<2x8xf32>
    %176 = vector.multi_reduction <maximumf>, %175, %cst_48 [2] : vector<2x8x8xf32> to vector<2x8xf32>
    %177 = vector.shape_cast %176 : vector<2x8xf32> to vector<2x8x1xf32>
    %178 = vector.broadcast %177 : vector<2x8x1xf32> to vector<2x8x8xf32>
    %179 = arith.subf %175, %178 : vector<2x8x8xf32>
    %180 = math.exp %179 : vector<2x8x8xf32>
    %cst_49 = arith.constant dense<0.000000e+00> : vector<2x8xf32>
    %181 = vector.multi_reduction <add>, %180, %cst_49 [2] : vector<2x8x8xf32> to vector<2x8xf32>
    %182 = vector.shape_cast %181 : vector<2x8xf32> to vector<2x8x1xf32>
    %183 = vector.broadcast %182 : vector<2x8x1xf32> to vector<2x8x8xf32>
    %184 = arith.divf %180, %183 : vector<2x8x8xf32>
    %185 = vector.broadcast %29 : vector<2x8x1xf32> to vector<2x8x8xf32>
    %186 = arith.mulf %184, %185 : vector<2x8x8xf32>
    "tpu.trace_start"() <{level = 10 : i32, message = "bqk,bkd->bqd"}> : () -> ()
    %cst_50 = arith.constant dense<0.000000e+00> : vector<2x8x8xf32>
    %187 = tpu.matmul %186, %170, %cst_50 {dimension_numbers = #tpu.dot_dimension_numbers<[2], [1], [1], [2], [0, 0, 0, 1, 1, 2], [0], [0]>} : vector<2x8x8xf32>, vector<2x8x8xf32>, vector<2x8x8xf32> -> vector<2x8x8xf32>
    "tpu.trace_stop"() : () -> ()
    %188 = vector.shape_cast %187 : vector<2x8x8xf32> to vector<16x8xf32>
    %189 = vector.extract_strided_slice %3 {offsets = [16, 96], sizes = [8, 32], strides = [1, 1]} : vector<32x128xf32> to vector<8x32xf32>
    %cst_51 = arith.constant dense<0.000000e+00> : vector<16x32xf32>
    %190 = tpu.matmul %188, %189, %cst_51 {dimension_numbers = #tpu.dot_dimension_numbers<[1], [0], [0], [1], [0, 0, 1, 1], [], []>} : vector<16x8xf32>, vector<8x32xf32>, vector<16x32xf32> -> vector<16x32xf32>
    %191 = arith.addf %164, %190 : vector<16x32xf32>
    %192 = vector.extract_strided_slice %106 {offsets = [0, 24], sizes = [16, 8], strides = [1, 1]} : vector<16x32xf32> to vector<16x8xf32>
    %193 = vector.shape_cast %192 : vector<16x8xf32> to vector<2x8x8xf32>
    %194 = vector.extract_strided_slice %107 {offsets = [0, 24], sizes = [16, 8], strides = [1, 1]} : vector<16x32xf32> to vector<16x8xf32>
    %195 = vector.shape_cast %194 : vector<16x8xf32> to vector<2x8x8xf32>
    %196 = vector.extract_strided_slice %108 {offsets = [0, 24], sizes = [16, 8], strides = [1, 1]} : vector<16x32xf32> to vector<16x8xf32>
    %197 = vector.shape_cast %196 : vector<16x8xf32> to vector<2x8x8xf32>
    "tpu.trace_start"() <{level = 10 : i32, message = "bqd,bkd->bqk"}> : () -> ()
    %cst_52 = arith.constant dense<0.000000e+00> : vector<2x8x8xf32>
    %198 = tpu.matmul %193, %195, %cst_52 {dimension_numbers = #tpu.dot_dimension_numbers<[2], [2], [1], [1], [0, 0, 0, 1, 1, 1], [0], [0]>} : vector<2x8x8xf32>, vector<2x8x8xf32>, vector<2x8x8xf32> -> vector<2x8x8xf32>
    "tpu.trace_stop"() : () -> ()
    %cst_53 = arith.constant 0.353553385 : f32
    %199 = vector.broadcast %cst_53 : f32 to vector<2x8x8xf32>
    %200 = arith.mulf %198, %199 : vector<2x8x8xf32>
    %cst_54 = arith.constant -1.000000e+30 : f32
    %201 = vector.broadcast %cst_54 : f32 to vector<2x8x8xf32>
    %202 = arith.select %37, %200, %201 : vector<2x8x8xi1>, vector<2x8x8xf32>
    %cst_55 = arith.constant dense<0xFF800000> : vector<2x8xf32>
    %203 = vector.multi_reduction <maximumf>, %202, %cst_55 [2] : vector<2x8x8xf32> to vector<2x8xf32>
    %204 = vector.shape_cast %203 : vector<2x8xf32> to vector<2x8x1xf32>
    %205 = vector.broadcast %204 : vector<2x8x1xf32> to vector<2x8x8xf32>
    %206 = arith.subf %202, %205 : vector<2x8x8xf32>
    %207 = math.exp %206 : vector<2x8x8xf32>
    %cst_56 = arith.constant dense<0.000000e+00> : vector<2x8xf32>
    %208 = vector.multi_reduction <add>, %207, %cst_56 [2] : vector<2x8x8xf32> to vector<2x8xf32>
    %209 = vector.shape_cast %208 : vector<2x8xf32> to vector<2x8x1xf32>
    %210 = vector.broadcast %209 : vector<2x8x1xf32> to vector<2x8x8xf32>
    %211 = arith.divf %207, %210 : vector<2x8x8xf32>
    %212 = vector.broadcast %29 : vector<2x8x1xf32> to vector<2x8x8xf32>
    %213 = arith.mulf %211, %212 : vector<2x8x8xf32>
    "tpu.trace_start"() <{level = 10 : i32, message = "bqk,bkd->bqd"}> : () -> ()
    %cst_57 = arith.constant dense<0.000000e+00> : vector<2x8x8xf32>
    %214 = tpu.matmul %213, %197, %cst_57 {dimension_numbers = #tpu.dot_dimension_numbers<[2], [1], [1], [2], [0, 0, 0, 1, 1, 2], [0], [0]>} : vector<2x8x8xf32>, vector<2x8x8xf32>, vector<2x8x8xf32> -> vector<2x8x8xf32>
    "tpu.trace_stop"() : () -> ()
    %215 = vector.shape_cast %214 : vector<2x8x8xf32> to vector<16x8xf32>
    %216 = vector.extract_strided_slice %3 {offsets = [24, 96], sizes = [8, 32], strides = [1, 1]} : vector<32x128xf32> to vector<8x32xf32>
    %cst_58 = arith.constant dense<0.000000e+00> : vector<16x32xf32>
    %217 = tpu.matmul %215, %216, %cst_58 {dimension_numbers = #tpu.dot_dimension_numbers<[1], [0], [0], [1], [0, 0, 1, 1], [], []>} : vector<16x8xf32>, vector<8x32xf32>, vector<16x32xf32> -> vector<16x32xf32>
    %218 = arith.addf %191, %217 : vector<16x32xf32>
    %219 = arith.addf %76, %218 : vector<16x32xf32>
    %220 = vector.extract_strided_slice %2 {offsets = [7, 0], sizes = [1, 32], strides = [1, 1]} : vector<32x128xf32> to vector<1x32xf32>
    %221 = vector.broadcast %220 : vector<1x32xf32> to vector<16x32xf32>
    %222 = arith.addf %219, %221 : vector<16x32xf32>
    %223 = vector.extract_strided_slice %2 {offsets = [8, 0], sizes = [1, 32], strides = [1, 1]} : vector<32x128xf32> to vector<1x32xf32>
    %224 = vector.extract_strided_slice %2 {offsets = [9, 0], sizes = [1, 32], strides = [1, 1]} : vector<32x128xf32> to vector<1x32xf32>
    %cst_59 = arith.constant dense<0.000000e+00> : vector<16xf32>
    %225 = vector.multi_reduction <add>, %222, %cst_59 [1] : vector<16x32xf32> to vector<16xf32>
    %226 = vector.shape_cast %225 : vector<16xf32> to vector<16x1xf32>
    %cst_60 = arith.constant 3.200000e+01 : f32
    %227 = vector.broadcast %cst_60 : f32 to vector<16x1xf32>
    %228 = arith.divf %226, %227 : vector<16x1xf32>
    %229 = vector.broadcast %228 : vector<16x1xf32> to vector<16x32xf32>
    %230 = arith.subf %222, %229 : vector<16x32xf32>
    %231 = arith.mulf %230, %230 : vector<16x32xf32>
    %cst_61 = arith.constant dense<0.000000e+00> : vector<16xf32>
    %232 = vector.multi_reduction <add>, %231, %cst_61 [1] : vector<16x32xf32> to vector<16xf32>
    %233 = vector.shape_cast %232 : vector<16xf32> to vector<16x1xf32>
    %cst_62 = arith.constant 3.200000e+01 : f32
    %234 = vector.broadcast %cst_62 : f32 to vector<16x1xf32>
    %235 = arith.divf %233, %234 : vector<16x1xf32>
    %236 = vector.broadcast %228 : vector<16x1xf32> to vector<16x32xf32>
    %237 = arith.subf %222, %236 : vector<16x32xf32>
    %cst_63 = arith.constant 9.99999974E-6 : f32
    %238 = vector.broadcast %cst_63 : f32 to vector<16x1xf32>
    %239 = arith.addf %235, %238 : vector<16x1xf32>
    %240 = math.rsqrt %239 : vector<16x1xf32>
    %241 = vector.broadcast %240 : vector<16x1xf32> to vector<16x32xf32>
    %242 = arith.mulf %237, %241 : vector<16x32xf32>
    %243 = vector.broadcast %223 : vector<1x32xf32> to vector<16x32xf32>
    %244 = arith.mulf %242, %243 : vector<16x32xf32>
    %245 = vector.broadcast %224 : vector<1x32xf32> to vector<16x32xf32>
    %246 = arith.addf %244, %245 : vector<16x32xf32>
    %247 = vector.broadcast %30 : vector<16x1xf32> to vector<16x32xf32>
    %248 = arith.mulf %246, %247 : vector<16x32xf32>
    %249 = vector.extract_strided_slice %6 {offsets = [0, 0], sizes = [32, 64], strides = [1, 1]} : vector<32x96xf32> to vector<32x64xf32>
    %cst_64 = arith.constant dense<0.000000e+00> : vector<16x64xf32>
    %250 = tpu.matmul %248, %249, %cst_64 {dimension_numbers = #tpu.dot_dimension_numbers<[1], [0], [0], [1], [0, 0, 1, 1], [], []>} : vector<16x32xf32>, vector<32x64xf32>, vector<16x64xf32> -> vector<16x64xf32>
    %251 = vector.extract_strided_slice %2 {offsets = [10, 0], sizes = [1, 64], strides = [1, 1]} : vector<32x128xf32> to vector<1x64xf32>
    %252 = vector.broadcast %251 : vector<1x64xf32> to vector<16x64xf32>
    %253 = arith.addf %250, %252 : vector<16x64xf32>
    %254 = vector.extract_strided_slice %253 {offsets = [0, 0], sizes = [16, 32], strides = [1, 1]} : vector<16x64xf32> to vector<16x32xf32>
    %255 = vector.extract_strided_slice %253 {offsets = [0, 32], sizes = [16, 32], strides = [1, 1]} : vector<16x64xf32> to vector<16x32xf32>
    %256 = arith.negf %255 : vector<16x32xf32>
    %257 = math.exp %256 : vector<16x32xf32>
    %cst_65 = arith.constant 1.000000e+00 : f32
    %258 = vector.broadcast %cst_65 : f32 to vector<16x32xf32>
    %259 = arith.addf %258, %257 : vector<16x32xf32>
    %260 = arith.divf %258, %259 : vector<16x32xf32>
    %261 = arith.mulf %254, %260 : vector<16x32xf32>
    %cst_66 = arith.constant 0.000000e+00 : f32
    %262 = vector.broadcast %cst_66 : f32 to vector<16x32xf32>
    %263 = vector.shape_cast %25 : vector<2x8x1xi32> to vector<16x1xi32>
    %c-3_i32 = arith.constant -3 : i32
    %264 = vector.broadcast %c-3_i32 : i32 to vector<16x1xi32>
    %265 = arith.addi %263, %264 : vector<16x1xi32>
    %c0_i32_67 = arith.constant 0 : i32
    %266 = vector.broadcast %c0_i32_67 : i32 to vector<16x1xi32>
    %267 = arith.cmpi sge, %265, %266 : vector<16x1xi32>
    %c-3_i32_68 = arith.constant -3 : i32
    %268 = vector.broadcast %c-3_i32_68 : i32 to vector<16x1xi32>
    %269 = arith.addi %263, %268 : vector<16x1xi32>
    %c8_i32 = arith.constant 8 : i32
    %270 = vector.broadcast %c8_i32 : i32 to vector<16x1xi32>
    %271 = arith.cmpi slt, %269, %270 : vector<16x1xi32>
    %272 = arith.andi %267, %271 : vector<16x1xi1>
    %273 = arith.extui %272 : vector<16x1xi1> to vector<16x1xi32>
    %274 = arith.sitofp %273 : vector<16x1xi32> to vector<16x1xf32>
    %c3_i32 = arith.constant 3 : i32
    %275 = tpu.dynamic_rotate %261 by %c3_i32 dim 0 : vector<16x32xf32>, i32 -> vector<16x32xf32>
    %276 = vector.broadcast %274 : vector<16x1xf32> to vector<16x32xf32>
    %277 = arith.mulf %275, %276 : vector<16x32xf32>
    %278 = vector.extract_strided_slice %2 {offsets = [21, 0], sizes = [1, 32], strides = [1, 1]} : vector<32x128xf32> to vector<1x32xf32>
    %279 = vector.broadcast %278 : vector<1x32xf32> to vector<16x32xf32>
    %280 = arith.mulf %277, %279 : vector<16x32xf32>
    %281 = arith.addf %262, %280 : vector<16x32xf32>
    %c-2_i32 = arith.constant -2 : i32
    %282 = vector.broadcast %c-2_i32 : i32 to vector<16x1xi32>
    %283 = arith.addi %263, %282 : vector<16x1xi32>
    %c0_i32_69 = arith.constant 0 : i32
    %284 = vector.broadcast %c0_i32_69 : i32 to vector<16x1xi32>
    %285 = arith.cmpi sge, %283, %284 : vector<16x1xi32>
    %c-2_i32_70 = arith.constant -2 : i32
    %286 = vector.broadcast %c-2_i32_70 : i32 to vector<16x1xi32>
    %287 = arith.addi %263, %286 : vector<16x1xi32>
    %c8_i32_71 = arith.constant 8 : i32
    %288 = vector.broadcast %c8_i32_71 : i32 to vector<16x1xi32>
    %289 = arith.cmpi slt, %287, %288 : vector<16x1xi32>
    %290 = arith.andi %285, %289 : vector<16x1xi1>
    %291 = arith.extui %290 : vector<16x1xi1> to vector<16x1xi32>
    %292 = arith.sitofp %291 : vector<16x1xi32> to vector<16x1xf32>
    %c2_i32_72 = arith.constant 2 : i32
    %293 = tpu.dynamic_rotate %261 by %c2_i32_72 dim 0 : vector<16x32xf32>, i32 -> vector<16x32xf32>
    %294 = vector.broadcast %292 : vector<16x1xf32> to vector<16x32xf32>
    %295 = arith.mulf %293, %294 : vector<16x32xf32>
    %296 = vector.extract_strided_slice %2 {offsets = [22, 0], sizes = [1, 32], strides = [1, 1]} : vector<32x128xf32> to vector<1x32xf32>
    %297 = vector.broadcast %296 : vector<1x32xf32> to vector<16x32xf32>
    %298 = arith.mulf %295, %297 : vector<16x32xf32>
    %299 = arith.addf %281, %298 : vector<16x32xf32>
    %c-1_i32 = arith.constant -1 : i32
    %300 = vector.broadcast %c-1_i32 : i32 to vector<16x1xi32>
    %301 = arith.addi %263, %300 : vector<16x1xi32>
    %c0_i32_73 = arith.constant 0 : i32
    %302 = vector.broadcast %c0_i32_73 : i32 to vector<16x1xi32>
    %303 = arith.cmpi sge, %301, %302 : vector<16x1xi32>
    %c-1_i32_74 = arith.constant -1 : i32
    %304 = vector.broadcast %c-1_i32_74 : i32 to vector<16x1xi32>
    %305 = arith.addi %263, %304 : vector<16x1xi32>
    %c8_i32_75 = arith.constant 8 : i32
    %306 = vector.broadcast %c8_i32_75 : i32 to vector<16x1xi32>
    %307 = arith.cmpi slt, %305, %306 : vector<16x1xi32>
    %308 = arith.andi %303, %307 : vector<16x1xi1>
    %309 = arith.extui %308 : vector<16x1xi1> to vector<16x1xi32>
    %310 = arith.sitofp %309 : vector<16x1xi32> to vector<16x1xf32>
    %c1_i32_76 = arith.constant 1 : i32
    %311 = tpu.dynamic_rotate %261 by %c1_i32_76 dim 0 : vector<16x32xf32>, i32 -> vector<16x32xf32>
    %312 = vector.broadcast %310 : vector<16x1xf32> to vector<16x32xf32>
    %313 = arith.mulf %311, %312 : vector<16x32xf32>
    %314 = vector.extract_strided_slice %2 {offsets = [23, 0], sizes = [1, 32], strides = [1, 1]} : vector<32x128xf32> to vector<1x32xf32>
    %315 = vector.broadcast %314 : vector<1x32xf32> to vector<16x32xf32>
    %316 = arith.mulf %313, %315 : vector<16x32xf32>
    %317 = arith.addf %299, %316 : vector<16x32xf32>
    %c0_i32_77 = arith.constant 0 : i32
    %318 = vector.broadcast %c0_i32_77 : i32 to vector<16x1xi32>
    %319 = arith.addi %263, %318 : vector<16x1xi32>
    %c0_i32_78 = arith.constant 0 : i32
    %320 = vector.broadcast %c0_i32_78 : i32 to vector<16x1xi32>
    %321 = arith.cmpi sge, %319, %320 : vector<16x1xi32>
    %c0_i32_79 = arith.constant 0 : i32
    %322 = vector.broadcast %c0_i32_79 : i32 to vector<16x1xi32>
    %323 = arith.addi %263, %322 : vector<16x1xi32>
    %c8_i32_80 = arith.constant 8 : i32
    %324 = vector.broadcast %c8_i32_80 : i32 to vector<16x1xi32>
    %325 = arith.cmpi slt, %323, %324 : vector<16x1xi32>
    %326 = arith.andi %321, %325 : vector<16x1xi1>
    %327 = arith.extui %326 : vector<16x1xi1> to vector<16x1xi32>
    %328 = arith.sitofp %327 : vector<16x1xi32> to vector<16x1xf32>
    %329 = vector.broadcast %328 : vector<16x1xf32> to vector<16x32xf32>
    %330 = arith.mulf %261, %329 : vector<16x32xf32>
    %331 = vector.extract_strided_slice %2 {offsets = [24, 0], sizes = [1, 32], strides = [1, 1]} : vector<32x128xf32> to vector<1x32xf32>
    %332 = vector.broadcast %331 : vector<1x32xf32> to vector<16x32xf32>
    %333 = arith.mulf %330, %332 : vector<16x32xf32>
    %334 = arith.addf %317, %333 : vector<16x32xf32>
    %c1_i32_81 = arith.constant 1 : i32
    %335 = vector.broadcast %c1_i32_81 : i32 to vector<16x1xi32>
    %336 = arith.addi %263, %335 : vector<16x1xi32>
    %c0_i32_82 = arith.constant 0 : i32
    %337 = vector.broadcast %c0_i32_82 : i32 to vector<16x1xi32>
    %338 = arith.cmpi sge, %336, %337 : vector<16x1xi32>
    %c1_i32_83 = arith.constant 1 : i32
    %339 = vector.broadcast %c1_i32_83 : i32 to vector<16x1xi32>
    %340 = arith.addi %263, %339 : vector<16x1xi32>
    %c8_i32_84 = arith.constant 8 : i32
    %341 = vector.broadcast %c8_i32_84 : i32 to vector<16x1xi32>
    %342 = arith.cmpi slt, %340, %341 : vector<16x1xi32>
    %343 = arith.andi %338, %342 : vector<16x1xi1>
    %344 = arith.extui %343 : vector<16x1xi1> to vector<16x1xi32>
    %345 = arith.sitofp %344 : vector<16x1xi32> to vector<16x1xf32>
    %c15_i32 = arith.constant 15 : i32
    %346 = tpu.dynamic_rotate %261 by %c15_i32 dim 0 : vector<16x32xf32>, i32 -> vector<16x32xf32>
    %347 = vector.broadcast %345 : vector<16x1xf32> to vector<16x32xf32>
    %348 = arith.mulf %346, %347 : vector<16x32xf32>
    %349 = vector.extract_strided_slice %2 {offsets = [25, 0], sizes = [1, 32], strides = [1, 1]} : vector<32x128xf32> to vector<1x32xf32>
    %350 = vector.broadcast %349 : vector<1x32xf32> to vector<16x32xf32>
    %351 = arith.mulf %348, %350 : vector<16x32xf32>
    %352 = arith.addf %334, %351 : vector<16x32xf32>
    %c2_i32_85 = arith.constant 2 : i32
    %353 = vector.broadcast %c2_i32_85 : i32 to vector<16x1xi32>
    %354 = arith.addi %263, %353 : vector<16x1xi32>
    %c0_i32_86 = arith.constant 0 : i32
    %355 = vector.broadcast %c0_i32_86 : i32 to vector<16x1xi32>
    %356 = arith.cmpi sge, %354, %355 : vector<16x1xi32>
    %c2_i32_87 = arith.constant 2 : i32
    %357 = vector.broadcast %c2_i32_87 : i32 to vector<16x1xi32>
    %358 = arith.addi %263, %357 : vector<16x1xi32>
    %c8_i32_88 = arith.constant 8 : i32
    %359 = vector.broadcast %c8_i32_88 : i32 to vector<16x1xi32>
    %360 = arith.cmpi slt, %358, %359 : vector<16x1xi32>
    %361 = arith.andi %356, %360 : vector<16x1xi1>
    %362 = arith.extui %361 : vector<16x1xi1> to vector<16x1xi32>
    %363 = arith.sitofp %362 : vector<16x1xi32> to vector<16x1xf32>
    %c14_i32 = arith.constant 14 : i32
    %364 = tpu.dynamic_rotate %261 by %c14_i32 dim 0 : vector<16x32xf32>, i32 -> vector<16x32xf32>
    %365 = vector.broadcast %363 : vector<16x1xf32> to vector<16x32xf32>
    %366 = arith.mulf %364, %365 : vector<16x32xf32>
    %367 = vector.extract_strided_slice %2 {offsets = [26, 0], sizes = [1, 32], strides = [1, 1]} : vector<32x128xf32> to vector<1x32xf32>
    %368 = vector.broadcast %367 : vector<1x32xf32> to vector<16x32xf32>
    %369 = arith.mulf %366, %368 : vector<16x32xf32>
    %370 = arith.addf %352, %369 : vector<16x32xf32>
    %c3_i32_89 = arith.constant 3 : i32
    %371 = vector.broadcast %c3_i32_89 : i32 to vector<16x1xi32>
    %372 = arith.addi %263, %371 : vector<16x1xi32>
    %c0_i32_90 = arith.constant 0 : i32
    %373 = vector.broadcast %c0_i32_90 : i32 to vector<16x1xi32>
    %374 = arith.cmpi sge, %372, %373 : vector<16x1xi32>
    %c3_i32_91 = arith.constant 3 : i32
    %375 = vector.broadcast %c3_i32_91 : i32 to vector<16x1xi32>
    %376 = arith.addi %263, %375 : vector<16x1xi32>
    %c8_i32_92 = arith.constant 8 : i32
    %377 = vector.broadcast %c8_i32_92 : i32 to vector<16x1xi32>
    %378 = arith.cmpi slt, %376, %377 : vector<16x1xi32>
    %379 = arith.andi %374, %378 : vector<16x1xi1>
    %380 = arith.extui %379 : vector<16x1xi1> to vector<16x1xi32>
    %381 = arith.sitofp %380 : vector<16x1xi32> to vector<16x1xf32>
    %c13_i32 = arith.constant 13 : i32
    %382 = tpu.dynamic_rotate %261 by %c13_i32 dim 0 : vector<16x32xf32>, i32 -> vector<16x32xf32>
    %383 = vector.broadcast %381 : vector<16x1xf32> to vector<16x32xf32>
    %384 = arith.mulf %382, %383 : vector<16x32xf32>
    %385 = vector.extract_strided_slice %2 {offsets = [27, 0], sizes = [1, 32], strides = [1, 1]} : vector<32x128xf32> to vector<1x32xf32>
    %386 = vector.broadcast %385 : vector<1x32xf32> to vector<16x32xf32>
    %387 = arith.mulf %384, %386 : vector<16x32xf32>
    %388 = arith.addf %370, %387 : vector<16x32xf32>
    %389 = vector.extract_strided_slice %2 {offsets = [11, 0], sizes = [1, 32], strides = [1, 1]} : vector<32x128xf32> to vector<1x32xf32>
    %390 = vector.broadcast %389 : vector<1x32xf32> to vector<16x32xf32>
    %391 = arith.addf %388, %390 : vector<16x32xf32>
    %392 = vector.extract_strided_slice %2 {offsets = [12, 0], sizes = [1, 32], strides = [1, 1]} : vector<32x128xf32> to vector<1x32xf32>
    %393 = vector.extract_strided_slice %2 {offsets = [13, 0], sizes = [1, 32], strides = [1, 1]} : vector<32x128xf32> to vector<1x32xf32>
    %cst_93 = arith.constant dense<0.000000e+00> : vector<16xf32>
    %394 = vector.multi_reduction <add>, %391, %cst_93 [1] : vector<16x32xf32> to vector<16xf32>
    %395 = vector.shape_cast %394 : vector<16xf32> to vector<16x1xf32>
    %cst_94 = arith.constant 3.200000e+01 : f32
    %396 = vector.broadcast %cst_94 : f32 to vector<16x1xf32>
    %397 = arith.divf %395, %396 : vector<16x1xf32>
    %398 = vector.broadcast %397 : vector<16x1xf32> to vector<16x32xf32>
    %399 = arith.subf %391, %398 : vector<16x32xf32>
    %400 = arith.mulf %399, %399 : vector<16x32xf32>
    %cst_95 = arith.constant dense<0.000000e+00> : vector<16xf32>
    %401 = vector.multi_reduction <add>, %400, %cst_95 [1] : vector<16x32xf32> to vector<16xf32>
    %402 = vector.shape_cast %401 : vector<16xf32> to vector<16x1xf32>
    %cst_96 = arith.constant 3.200000e+01 : f32
    %403 = vector.broadcast %cst_96 : f32 to vector<16x1xf32>
    %404 = arith.divf %402, %403 : vector<16x1xf32>
    %405 = vector.broadcast %397 : vector<16x1xf32> to vector<16x32xf32>
    %406 = arith.subf %391, %405 : vector<16x32xf32>
    %cst_97 = arith.constant 9.99999974E-6 : f32
    %407 = vector.broadcast %cst_97 : f32 to vector<16x1xf32>
    %408 = arith.addf %404, %407 : vector<16x1xf32>
    %409 = math.rsqrt %408 : vector<16x1xf32>
    %410 = vector.broadcast %409 : vector<16x1xf32> to vector<16x32xf32>
    %411 = arith.mulf %406, %410 : vector<16x32xf32>
    %412 = vector.broadcast %392 : vector<1x32xf32> to vector<16x32xf32>
    %413 = arith.mulf %411, %412 : vector<16x32xf32>
    %414 = vector.broadcast %393 : vector<1x32xf32> to vector<16x32xf32>
    %415 = arith.addf %413, %414 : vector<16x32xf32>
    %416 = arith.negf %415 : vector<16x32xf32>
    %417 = math.exp %416 : vector<16x32xf32>
    %cst_98 = arith.constant 1.000000e+00 : f32
    %418 = vector.broadcast %cst_98 : f32 to vector<16x32xf32>
    %419 = arith.addf %418, %417 : vector<16x32xf32>
    %420 = arith.divf %418, %419 : vector<16x32xf32>
    %421 = arith.mulf %415, %420 : vector<16x32xf32>
    %422 = vector.extract_strided_slice %6 {offsets = [0, 64], sizes = [32, 32], strides = [1, 1]} : vector<32x96xf32> to vector<32x32xf32>
    %cst_99 = arith.constant dense<0.000000e+00> : vector<16x32xf32>
    %423 = tpu.matmul %421, %422, %cst_99 {dimension_numbers = #tpu.dot_dimension_numbers<[1], [0], [0], [1], [0, 0, 1, 1], [], []>} : vector<16x32xf32>, vector<32x32xf32>, vector<16x32xf32> -> vector<16x32xf32>
    %424 = vector.extract_strided_slice %2 {offsets = [14, 0], sizes = [1, 32], strides = [1, 1]} : vector<32x128xf32> to vector<1x32xf32>
    %425 = vector.broadcast %424 : vector<1x32xf32> to vector<16x32xf32>
    %426 = arith.addf %423, %425 : vector<16x32xf32>
    %427 = vector.broadcast %30 : vector<16x1xf32> to vector<16x32xf32>
    %428 = arith.mulf %426, %427 : vector<16x32xf32>
    %429 = arith.addf %222, %428 : vector<16x32xf32>
    %430 = vector.extract_strided_slice %2 {offsets = [15, 0], sizes = [1, 32], strides = [1, 1]} : vector<32x128xf32> to vector<1x32xf32>
    %431 = vector.extract_strided_slice %2 {offsets = [16, 0], sizes = [1, 32], strides = [1, 1]} : vector<32x128xf32> to vector<1x32xf32>
    %cst_100 = arith.constant dense<0.000000e+00> : vector<16xf32>
    %432 = vector.multi_reduction <add>, %429, %cst_100 [1] : vector<16x32xf32> to vector<16xf32>
    %433 = vector.shape_cast %432 : vector<16xf32> to vector<16x1xf32>
    %cst_101 = arith.constant 3.200000e+01 : f32
    %434 = vector.broadcast %cst_101 : f32 to vector<16x1xf32>
    %435 = arith.divf %433, %434 : vector<16x1xf32>
    %436 = vector.broadcast %435 : vector<16x1xf32> to vector<16x32xf32>
    %437 = arith.subf %429, %436 : vector<16x32xf32>
    %438 = arith.mulf %437, %437 : vector<16x32xf32>
    %cst_102 = arith.constant dense<0.000000e+00> : vector<16xf32>
    %439 = vector.multi_reduction <add>, %438, %cst_102 [1] : vector<16x32xf32> to vector<16xf32>
    %440 = vector.shape_cast %439 : vector<16xf32> to vector<16x1xf32>
    %cst_103 = arith.constant 3.200000e+01 : f32
    %441 = vector.broadcast %cst_103 : f32 to vector<16x1xf32>
    %442 = arith.divf %440, %441 : vector<16x1xf32>
    %443 = vector.broadcast %435 : vector<16x1xf32> to vector<16x32xf32>
    %444 = arith.subf %429, %443 : vector<16x32xf32>
    %cst_104 = arith.constant 9.99999974E-6 : f32
    %445 = vector.broadcast %cst_104 : f32 to vector<16x1xf32>
    %446 = arith.addf %442, %445 : vector<16x1xf32>
    %447 = math.rsqrt %446 : vector<16x1xf32>
    %448 = vector.broadcast %447 : vector<16x1xf32> to vector<16x32xf32>
    %449 = arith.mulf %444, %448 : vector<16x32xf32>
    %450 = vector.broadcast %430 : vector<1x32xf32> to vector<16x32xf32>
    %451 = arith.mulf %449, %450 : vector<16x32xf32>
    %452 = vector.broadcast %431 : vector<1x32xf32> to vector<16x32xf32>
    %453 = arith.addf %451, %452 : vector<16x32xf32>
    %454 = vector.extract_strided_slice %4 {offsets = [0, 64], sizes = [32, 64], strides = [1, 1]} : vector<32x128xf32> to vector<32x64xf32>
    %cst_105 = arith.constant dense<0.000000e+00> : vector<16x64xf32>
    %455 = tpu.matmul %453, %454, %cst_105 {dimension_numbers = #tpu.dot_dimension_numbers<[1], [0], [0], [1], [0, 0, 1, 1], [], []>} : vector<16x32xf32>, vector<32x64xf32>, vector<16x64xf32> -> vector<16x64xf32>
    %456 = vector.extract_strided_slice %2 {offsets = [17, 0], sizes = [1, 64], strides = [1, 1]} : vector<32x128xf32> to vector<1x64xf32>
    %457 = vector.broadcast %456 : vector<1x64xf32> to vector<16x64xf32>
    %458 = arith.addf %455, %457 : vector<16x64xf32>
    %cst_106 = arith.constant 0.000000e+00 : f32
    %459 = vector.broadcast %cst_106 : f32 to vector<16x64xf32>
    %460 = arith.maximumf %458, %459 : vector<16x64xf32>
    %461 = vector.extract_strided_slice %5 {offsets = [0, 32], sizes = [64, 32], strides = [1, 1]} : vector<64x64xf32> to vector<64x32xf32>
    %cst_107 = arith.constant dense<0.000000e+00> : vector<16x32xf32>
    %462 = tpu.matmul %460, %461, %cst_107 {dimension_numbers = #tpu.dot_dimension_numbers<[1], [0], [0], [1], [0, 0, 1, 1], [], []>} : vector<16x64xf32>, vector<64x32xf32>, vector<16x32xf32> -> vector<16x32xf32>
    %463 = vector.extract_strided_slice %2 {offsets = [18, 0], sizes = [1, 32], strides = [1, 1]} : vector<32x128xf32> to vector<1x32xf32>
    %464 = vector.broadcast %463 : vector<1x32xf32> to vector<16x32xf32>
    %465 = arith.addf %462, %464 : vector<16x32xf32>
    %cst_108 = arith.constant 5.000000e-01 : f32
    %466 = vector.broadcast %cst_108 : f32 to vector<16x32xf32>
    %467 = arith.mulf %466, %465 : vector<16x32xf32>
    %468 = arith.addf %429, %467 : vector<16x32xf32>
    %469 = vector.extract_strided_slice %2 {offsets = [19, 0], sizes = [1, 32], strides = [1, 1]} : vector<32x128xf32> to vector<1x32xf32>
    %470 = vector.extract_strided_slice %2 {offsets = [20, 0], sizes = [1, 32], strides = [1, 1]} : vector<32x128xf32> to vector<1x32xf32>
    %cst_109 = arith.constant dense<0.000000e+00> : vector<16xf32>
    %471 = vector.multi_reduction <add>, %468, %cst_109 [1] : vector<16x32xf32> to vector<16xf32>
    %472 = vector.shape_cast %471 : vector<16xf32> to vector<16x1xf32>
    %cst_110 = arith.constant 3.200000e+01 : f32
    %473 = vector.broadcast %cst_110 : f32 to vector<16x1xf32>
    %474 = arith.divf %472, %473 : vector<16x1xf32>
    %475 = vector.broadcast %474 : vector<16x1xf32> to vector<16x32xf32>
    %476 = arith.subf %468, %475 : vector<16x32xf32>
    %477 = arith.mulf %476, %476 : vector<16x32xf32>
    %cst_111 = arith.constant dense<0.000000e+00> : vector<16xf32>
    %478 = vector.multi_reduction <add>, %477, %cst_111 [1] : vector<16x32xf32> to vector<16xf32>
    %479 = vector.shape_cast %478 : vector<16xf32> to vector<16x1xf32>
    %cst_112 = arith.constant 3.200000e+01 : f32
    %480 = vector.broadcast %cst_112 : f32 to vector<16x1xf32>
    %481 = arith.divf %479, %480 : vector<16x1xf32>
    %482 = vector.broadcast %474 : vector<16x1xf32> to vector<16x32xf32>
    %483 = arith.subf %468, %482 : vector<16x32xf32>
    %cst_113 = arith.constant 9.99999974E-6 : f32
    %484 = vector.broadcast %cst_113 : f32 to vector<16x1xf32>
    %485 = arith.addf %481, %484 : vector<16x1xf32>
    %486 = math.rsqrt %485 : vector<16x1xf32>
    %487 = vector.broadcast %486 : vector<16x1xf32> to vector<16x32xf32>
    %488 = arith.mulf %483, %487 : vector<16x32xf32>
    %489 = vector.broadcast %469 : vector<1x32xf32> to vector<16x32xf32>
    %490 = arith.mulf %488, %489 : vector<16x32xf32>
    %491 = vector.broadcast %470 : vector<1x32xf32> to vector<16x32xf32>
    %492 = arith.addf %490, %491 : vector<16x32xf32>
    %493 = tpu.concatenate %492, %109 in 1 : vector<16x32xf32>, vector<16x64xf32> -> vector<16x96xf32>
    %494 = vector.shape_cast %493 : vector<16x96xf32> to vector<2x8x96xf32>
    %c0_114 = arith.constant 0 : index
    %c0_115 = arith.constant 0 : index
    %c0_116 = arith.constant 0 : index
    %495 = vector.load %arg8[%c0_114, %c0_115, %c0_116] : memref<2x8x96xf32, #tpu.memory_space<vmem>>, vector<2x8x96xf32>
    tpu.vector_store %arg8[%c0_114, %c0_115, %c0_116], %494 {strides = array<i32>} : memref<2x8x96xf32, #tpu.memory_space<vmem>>, vector<2x8x96xf32>,
    return
  }
  func.func @transform_0(%arg0: i32, %arg1: memref<2xi32, #tpu.memory_space<smem>>) -> (i32, i32, i32) {
    %c0_i32 = arith.constant 0 : i32
    %c0_i32_0 = arith.constant 0 : i32
    %c0_i32_1 = arith.constant 0 : i32
    return %arg0, %c0_i32, %c0_i32_0 : i32, i32, i32
  }
  func.func @transform_1(%arg0: i32, %arg1: memref<2xi32, #tpu.memory_space<smem>>) -> (i32, i32) {
    %c0_i32 = arith.constant 0 : i32
    %c0_i32_0 = arith.constant 0 : i32
    %c0_i32_1 = arith.constant 0 : i32
    return %c0_i32, %c0_i32_0 : i32, i32
  }
  func.func @transform_2(%arg0: i32, %arg1: memref<2xi32, #tpu.memory_space<smem>>) -> (i32, i32) {
    %c0_i32 = arith.constant 0 : i32
    %c0_i32_0 = arith.constant 0 : i32
    %c0_i32_1 = arith.constant 0 : i32
    return %c0_i32, %c0_i32_0 : i32, i32
  }
  func.func @transform_3(%arg0: i32, %arg1: memref<2xi32, #tpu.memory_space<smem>>) -> (i32, i32) {
    %c0_i32 = arith.constant 0 : i32
    %c0_i32_0 = arith.constant 0 : i32
    %c0_i32_1 = arith.constant 0 : i32
    return %c0_i32, %c0_i32_0 : i32, i32
  }
  func.func @transform_4(%arg0: i32, %arg1: memref<2xi32, #tpu.memory_space<smem>>) -> (i32, i32) {
    %c0_i32 = arith.constant 0 : i32
    %c0_i32_0 = arith.constant 0 : i32
    %c0_i32_1 = arith.constant 0 : i32
    return %c0_i32, %c0_i32_0 : i32, i32
  }
  func.func @transform_5(%arg0: i32, %arg1: memref<2xi32, #tpu.memory_space<smem>>) -> (i32, i32) {
    %c0_i32 = arith.constant 0 : i32
    %c0_i32_0 = arith.constant 0 : i32
    %c0_i32_1 = arith.constant 0 : i32
    return %c0_i32, %c0_i32_0 : i32, i32
  }
  func.func @transform_6(%arg0: i32, %arg1: memref<2xi32, #tpu.memory_space<smem>>) -> (i32, i32, i32) {
    %c0_i32 = arith.constant 0 : i32
    %c0_i32_0 = arith.constant 0 : i32
    %c0_i32_1 = arith.constant 0 : i32
    return %arg0, %c0_i32, %c0_i32_0 : i32, i32, i32
  }
}

</mosaic_0001>

<bundles_post_ra>
// kernel: tpu_custom_call.1
= control target key start
LH: loop header
LB: loop body
LE: loop exit
PB: predicated region body
PF: predicated region fallthrough
CT: control target
= control target key end

     0   :  { %s3582_s24 = smov [#allocation3]   ;;  %s4210_s0 = inlined_call_operand.hbm [shape: s32[2], index: 0, kind: input, shape index: {}]   ;;  %s4211_s1 = inlined_call_operand.hbm [shape: f32[2,8,32], index: 1, kind: input, shape index: {}]   ;;  %s4212_s2 = inlined_call_operand.hbm [shape: f32[32,128], index: 2, kind: input, shape index: {}]   ;;  %s4213_s3 = inlined_call_operand.hbm [shape: f32[32,128], index: 3, kind: input, shape index: {}]   ;;  %s4214_s4 = inlined_call_operand.hbm [shape: f32[32,128], index: 4, kind: input, shape index: {}]   ;;  %s4215_s5 = inlined_call_operand.hbm [shape: f32[64,64], index: 5, kind: input, shape index: {}]   ;;  %s4216_s6 = inlined_call_operand.hbm [shape: f32[32,96], index: 6, kind: input, shape index: {}]   ;;  %s4217_s7 = inlined_call_operand.hbm [shape: f32[2,8,96], index: 7, kind: output, shape index: {}]  }
   0x1   :  { %13 = dma.hbm_to_smem %s4210_s0, 16, %s3582_s24, [#allocation2] }
   0x2   :  { %3570 = dma.done.wait [#allocation2], 16 }
   0x3   :  { %3571 = vsyncadd [#allocation2], 4294967280 }
   0x4   :  { %15 = sfence }
   0x5   :  { %16 = vsyncpa [#allocation5], 0 }
   0x6   :  { %17 = vsyncpa [#allocation8], 0 }
   0x7   :  { %18 = vsyncpa [#allocation11], 0 }
   0x8   :  { %19 = vsyncpa [#allocation14], 0 }
   0x9   :  { %20 = vsyncpa [#allocation6], 0  ;;  %s3583_s27 = smov [#allocation7]   ;;  %s3584_s29 = smov [#allocation10]  }
   0xa   :  { %s38_s28 = sshll.u32 %s3583_s27, 4  ;;  %s62_s30 = sshll.u32 %s3584_s29, 4  ;;  %s39_s28 = int_to_ptr.vmem [resolvable:$true] %s38_s28  ;;  %s63_s30 = int_to_ptr.vmem [resolvable:$true] %s62_s30 }
   0xb   :  { %s3438_s8 = scalar_lea.vmem %s39_s28, 512  ;;  %p3443_p1 = scmp.lt.s32.totalorder %s39_s28, %s39_s28 }
   0xc   :  { %p3439_p0 = scmp.ne.s32.totalorder %s39_s28, %s3438_s8  ;;  %p3444_p2 = scmp.lt.s32.totalorder %s3438_s8, %s3438_s8 }
   0xe   :  { %p3445_p3 = por %p3444_p2, %p3443_p1 }
  0x10   :  { %p3446_p4 = pnand %p3445_p3, %p3439_p0 }
  0x12   :  { %3449 = shalt.err (!%p3446_p4)
}
  0x13   :  { %s3585_s0 = smov 128   ;;  %s3586_s9 = smov 8  }
  0x14   :  { %44 = dma.hbm_to_vmem [thread:$0]  %s4212_s2, 512, %s39_s28, [#allocation8], %s3585_s0, %s3585_s0, %s3586_s9  }
  0x15   :  { %s3458_s12 = scalar_lea.vmem %s63_s30, 512  ;;  %p3463_p6 = scmp.lt.s32.totalorder %s63_s30, %s63_s30 }
  0x16   :  { %p3459_p5 = scmp.ne.s32.totalorder %s63_s30, %s3458_s12  ;;  %p3464_p7 = scmp.lt.s32.totalorder %s3458_s12, %s3458_s12 }
  0x18   :  { %p3465_p8 = por %p3464_p7, %p3463_p6 }
  0x1a   :  { %p3466_p9 = pnand %p3465_p8, %p3459_p5 }
  0x1c   :  { %3469 = shalt.err (!%p3466_p9)
}
  0x1d   :  { %68 = dma.hbm_to_vmem [thread:$0]  %s4214_s4, 512, %s63_s30, [#allocation11], %s3585_s0, %s3585_s0, %s3586_s9  }
  0x1e   :  { %s3587_s15 = smov [#allocation4]   ;;  %s3588_s17 = smov [#allocation9]  }
  0x1f   :  { %s26_s16 = sshll.u32 %s3587_s15, 4  ;;  %s50_s18 = sshll.u32 %s3588_s17, 4  ;;  %s27_s16 = int_to_ptr.vmem [resolvable:$true] %s26_s16  ;;  %s51_s18 = int_to_ptr.vmem [resolvable:$true] %s50_s18 }
  0x20   :  { %s3478_s2 = scalar_lea.vmem %s27_s16, 256  ;;  %p3483_p11 = scmp.lt.s32.totalorder %s27_s16, %s27_s16 }
  0x21   :  { %p3479_p10 = scmp.ne.s32.totalorder %s27_s16, %s3478_s2  ;;  %p3484_p12 = scmp.lt.s32.totalorder %s3478_s2, %s3478_s2 }
  0x23   :  { %p3485_p13 = por %p3484_p12, %p3483_p11 }
  0x25   :  { %p3486_p0 = pnand %p3485_p13, %p3479_p10 }
  0x27   :  { %3489 = shalt.err (!%p3486_p0)
}
  0x28   :  { %32 = dma.hbm_to_vmem [thread:$0]  %s4211_s1, 256, %s27_s16, [#allocation5], %s3585_s0, %s3585_s0, %s3586_s9  }
  0x29   :  { %s3498_s4 = scalar_lea.vmem %s51_s18, 512  ;;  %p3503_p2 = scmp.lt.s32.totalorder %s51_s18, %s51_s18 }
  0x2a   :  { %p3499_p1 = scmp.ne.s32.totalorder %s51_s18, %s3498_s4  ;;  %p3504_p3 = scmp.lt.s32.totalorder %s3498_s4, %s3498_s4 }
  0x2c   :  { %p3505_p4 = por %p3504_p3, %p3503_p2 }
  0x2e   :  { %p3506_p5 = pnand %p3505_p4, %p3499_p1 }
  0x30   :  { %3509 = shalt.err (!%p3506_p5)
}
  0x31   :  { %56 = dma.hbm_to_vmem [thread:$0]  %s4213_s3, 512, %s51_s18, [#allocation8], %s3585_s0, %s3585_s0, %s3586_s9  }
  0x32   :  { %s3589_s23 = smov [#allocation12]   ;;  %s3590_s25 = smov [#allocation13]  }
  0x33   :  { %s74_s24 = sshll.u32 %s3589_s23, 4  ;;  %s86_s26 = sshll.u32 %s3590_s25, 4  ;;  %s75_s24 = int_to_ptr.vmem [resolvable:$true] %s74_s24  ;;  %s87_s26 = int_to_ptr.vmem [resolvable:$true] %s86_s26 }
  0x34   :  { %s3518_s1 = scalar_lea.vmem %s75_s24, 1024  ;;  %p3523_p7 = scmp.lt.s32.totalorder %s75_s24, %s75_s24 }
  0x35   :  { %p3519_p6 = scmp.ne.s32.totalorder %s75_s24, %s3518_s1  ;;  %p3524_p8 = scmp.lt.s32.totalorder %s3518_s1, %s3518_s1 }
  0x37   :  { %p3525_p9 = por %p3524_p8, %p3523_p7 }
  0x39   :  { %p3526_p10 = pnand %p3525_p9, %p3519_p6 }
  0x3b   :  { %3529 = shalt.err (!%p3526_p10)
}
  0x3c   :  { %80 = dma.hbm_to_vmem [thread:$0]  %s4215_s5, 1024, %s75_s24, [#allocation11], %s3585_s0, %s3585_s0, %s3586_s9  }
  0x3d   :  { %s3538_s3 = scalar_lea.vmem %s87_s26, 512  ;;  %p3543_p12 = scmp.lt.s32.totalorder %s87_s26, %s87_s26 }
  0x3e   :  { %p3539_p11 = scmp.ne.s32.totalorder %s87_s26, %s3538_s3  ;;  %p3544_p13 = scmp.lt.s32.totalorder %s3538_s3, %s3538_s3 }
  0x40   :  { %p3545_p0 = por %p3544_p13, %p3543_p12 }
  0x42   :  { %p3546_p1 = pnand %p3545_p0, %p3539_p11 }
  0x44   :  { %3549 = shalt.err (!%p3546_p1)
}
  0x45   :  { %92 = dma.hbm_to_vmem [thread:$0]  %s4216_s6, 512, %s87_s26, [#allocation14], %s3585_s0, %s3585_s0, %s3586_s9  }
  0x46   :  { %3572 = dma.done.wait [#allocation5], 256  }
  0x47   :  { %3573 = vsyncadd [#allocation5], 4294967040 }
  0x48   :  { %3574 = dma.done.wait [#allocation8], 1024  }
  0x49   :  { %3575 = vsyncadd [#allocation8], 4294966272 }
  0x4a   :  { %3576 = dma.done.wait [#allocation11], 1536  }
  0x4b   :  { %3577 = vsyncadd [#allocation11], 4294965760 }
  0x4c   :  { %3578 = dma.done.wait [#allocation14], 512  }
  0x4d   :  { %3579 = vsyncadd [#allocation14], 4294966784  ;;  %vm157_vm0 = vcmask 261120   ;;  %v3685_v0 = vld [vmem:[#allocation4] sm:$0xff]  ;;  %v3687_v1 = vld [vmem:[#allocation4 + $0x8] sm:$0xff]  ;;  %v143_v27 = vlaneseq  ;;  %vm288_vm1 = vcmask 523264  }
  0x4e   :  { %v158_v2 = vsel %vm157_vm0, %v3685_v0, 0.0  ;;  %v161_v3 = vsel %vm157_vm0, %v3687_v1, 0.0  ;;  %v124_v14 = vld [vmem:[#allocation10 + $0x18] sm:$0xff]  ;;  %v123_v15 = vld [vmem:[#allocation10 + $0x10] sm:$0xff]  ;;  %v122_v16 = vld [vmem:[#allocation10 + $0x8] sm:$0xff]  ;;  %vm3592_vm2 = vmmov 0  }
  0x4f   :  { %159 = vadd.xlane.f32.xlu0 %v158_v2  ;;  %3121 = vmatprep.subr.mxu0 %v124_v14  ;;  %v121_v17 = vld [vmem:[#allocation10] sm:$0xff]  ;;  %v132_v18 = vld [vmem:[#allocation12 + $0x38] sm:$0xff]  ;;  %v131_v19 = vld [vmem:[#allocation12 + $0x30] sm:$0xff]  ;;  %v3698_v29 = vshrl.u32 %v143_v27, 7  ;;  %s3593_s5 = smov 96   ;;  %vm500_vm3 = vcmask 64512  }
  0x50   :  { %3122 = vmatpush3.msra.mxu0 %v124_v14  ;;  %3132 = vmatprep.subr.mxu1 %v132_v18  ;;  %v130_v20 = vld [vmem:[#allocation12 + $0x28] sm:$0xff]  ;;  %v129_v21 = vld [vmem:[#allocation12 + $0x20] sm:$0xff]  ;;  %v128_v43 = vld [vmem:[#allocation12 + $0x18] sm:$0xff]  ;;  %s138_s6 = sld [smem:[#allocation3]]  ;;  %s3594_s10 = smov 64  }
  0x51   :  { %3123 = vmatprep.subr.mxu0 %v123_v15  ;;  %3133 = vmatpush3.msra.mxu1 %v132_v18  ;;  %v3701_v30 = vsub.s32 0, %v3698_v29  ;;  %v3703_v31 = vld [vmem:[#allocation7] sm:$0xff]  ;;  %v3706_v32 = vsub.s32 1, %v3698_v29  ;;  %v127_v44 = vld [vmem:[#allocation12 + $0x10] sm:$0xff]  ;;  %v126_v45 = vld [vmem:[#allocation12 + $0x8] sm:$0xff]  ;;  %v3715_v47 = vsub.s32 2, %v3698_v29 }
  0x52   :  { %3124 = vmatpush3.msra.mxu0 %v123_v15  ;;  %3134 = vmatprep.subr.mxu1 %v131_v19  ;;  %v125_v46 = vld [vmem:[#allocation12] sm:$0xff]  ;;  %v3722_v55 = vsub.s32 3, %v3698_v29  ;;  %v3742_v14 = vld [vmem:[#allocation9 + $0x10] sm:$0xff]  ;;  %v3746_v15 = vld [vmem:[#allocation9 + $0x8] sm:$0xff]  ;;  %s2968_s8 = sld [smem:[#allocation3 + $0x1]]  ;;  %s3595_s11 = smov 88  }
  0x53   :  { %162 = vadd.xlane.f32.xlu0 %v161_v3  ;;  %3125 = vmatprep.subr.mxu0 %v122_v16  ;;  %v188_v33 = vrot.slane %v3703_v31, %v3701_v30  ;;  %v194_v36 = vrot.slane %v3703_v31, %v3706_v32  ;;  %v200_v48 = vrot.slane %v3703_v31, %v3715_v47  ;;  %s3596_s12 = smov 120   ;;  %s3597_s13 = smov 56   ;;  %vm2347_vm14 = vcmp.lt.s32.totalorder %v3698_v29, 3 }
  0x54   :  { %3126 = vmatpush3.msra.mxu0 %v122_v16  ;;  %3135 = vmatpush3.msra.mxu1 %v131_v19  ;;  %v287_v56 = vrot.slane %v3703_v31, %v3722_v55  ;;  %v3750_v16 = vld [vmem:[#allocation9] sm:$0xff]  ;;  %s3598_s14 = smov 32   ;;  %s3599_s15 = smov 80   ;;  %vm2368_vm15 = vcmp.lt.s32.totalorder %v3698_v29, 2 }
  0x55   :  { %3127 = vmatprep.subr.mxu0 %v121_v17  ;;  %3136 = vmatprep.subr.mxu1 %v130_v20  ;;  %s3600_s16 = smov 112   ;;  %s3601_s17 = smov 48  }
  0x56   :  { %3128 = vmatpush3.msra.mxu0 %v121_v17  ;;  %3137 = vmatpush3.msra.mxu1 %v130_v20  ;;  %s3602_s18 = smov 72   ;;  %s3603_s2 = smov 104  }
  0x57   :  { %3138 = vmatprep.subr.mxu1 %v129_v21  ;;  %s3604_s19 = smov 40   ;;  %s3605_s20 = smov [#allocation15]  }
  0x58   :  { %3139 = vmatpush3.msra.mxu1 %v129_v21  ;;  %s2953_s4 = sshll.u32 %s3605_s20, 4  ;;  %s2954_s4 = int_to_ptr.vmem [resolvable:$true] %s2953_s4 }
  0x59   :  { %3140 = vmatprep.subr.mxu1 %v128_v43  ;;  %s3550_s21 = scalar_lea.vmem %s2954_s4, 256  ;;  %p3555_p3 = scmp.lt.s32.totalorder %s2954_s4, %s2954_s4 }
  0x5a   :  { %3141 = vmatpush3.msra.mxu1 %v128_v43  ;;  %p3551_p2 = scmp.ne.s32.totalorder %s2954_s4, %s3550_s21  ;;  %p3556_p4 = scmp.lt.s32.totalorder %s3550_s21, %s3550_s21 }
  0x5b   :  { %3142 = vmatprep.subr.mxu1 %v127_v44 }
  0x5c   :  { %3143 = vmatpush3.msra.mxu1 %v127_v44  ;;  %p3557_p5 = por %p3556_p4, %p3555_p3 }
  0x5d   :  { %3144 = vmatprep.subr.mxu1 %v126_v45 }
  0x5e   :  { %3145 = vmatpush3.msra.mxu1 %v126_v45  ;;  %p3558_p6 = pnand %p3557_p5, %p3551_p2 }
  0x5f   :  { %3146 = vmatprep.subr.mxu1 %v125_v46 }
  0x60   :  { %3147 = vmatpush3.msra.mxu1 %v125_v46 }
  0xd8   :  { %v160_v4 = vpop.xlane.xlu0 %159 }
  0xd9   :  { %v165_v5 = vmul.f32 0.03125, %v160_v4 }
  0xdb   :  { %v167_v6 = vsub.f32 %v3685_v0, %v165_v5 }
  0xdc   :  { %v163_v7 = vpop.xlane.xlu0 %162 }
  0xdd   :  { %v166_v8 = vmul.f32 0.03125, %v163_v7  ;;  %v169_v9 = vmul.f32 %v167_v6, %v167_v6 }
  0xdf   :  { %v168_v10 = vsub.f32 %v3687_v1, %v166_v8  ;;  %v171_v11 = vsel %vm157_vm0, %v169_v9, 0.0 }
  0xe0   :  { %172 = vadd.xlane.f32.xlu1 %v171_v11 }
  0xe1   :  { %v170_v12 = vmul.f32 %v168_v10, %v168_v10 }
  0xe3   :  { %v174_v13 = vsel %vm157_vm0, %v170_v12, 0.0 }
  0xe4   :  { %175 = vadd.xlane.f32.xlu1 %v174_v13  ;;  %v3740_v13 = vld [vmem:[#allocation9 + $0x18] sm:$0xff] }
  0xe5   :  { %3151 = vmatprep.subr.mxu0 %v3740_v13 }
 0x169   :  { %v173_v22 = vpop.xlane.xlu1 %172 }
 0x16a   :  { %v177_v23 = vmul.f32 0.03125, %v173_v22 }
 0x16c   :  { %v179_v24 = vadd.f32 1e-05, %v177_v23  ;;  %v3757_v23 = vsub.s32 4, %v3698_v29 }
 0x16d   :  { %v176_v25 = vpop.xlane.xlu1 %175 }
 0x16e   :  { %3338 = vrsqrt.f32 %v179_v24  ;;  %v178_v26 = vmul.f32 0.03125, %v176_v25  ;;  %v403_v25 = vrot.slane %v3703_v31, %v3757_v23 }
 0x170   :  { %v180_v28 = vadd.f32 1e-05, %v178_v26  ;;  %v3762_v26 = vsub.s32 5, %v3698_v29 }
 0x172   :  { %3340 = vrsqrt.f32 %v180_v28 }
 0x17b   :  { %v3339_v34 = vpop.eup %3338 }
 0x17c   :  { %v183_v35 = vmul.f32 %v3339_v34, %v167_v6 }
 0x17e   :  { %v189_v37 = vmul.f32 %v188_v33, %v183_v35 }
 0x17f   :  { %v3341_v38 = vpop.eup %3340 }
 0x180   :  { %v184_v39 = vmul.f32 %v3341_v38, %v168_v10  ;;  %v195_v40 = vadd.f32 %v194_v36, %v189_v37 }
 0x182   :  { %v190_v41 = vmul.f32 %v188_v33, %v184_v39  ;;  %3129 = vmatprep.mubr.msk.f32.mxu0 %vm157_vm0, %v195_v40  ;;  %v3591_v40 = vmov 0.0  }
 0x183   :  { %3177 = vmatprep.subr.mxu1 %v3591_v40 }
 0x184   :  { %v196_v42 = vadd.f32 %v194_v36, %v190_v41  ;;  %v409_v36 = vrot.slane %v3703_v31, %v3762_v26  ;;  %v3771_v41 = vsub.s32 6, %v3698_v29 }
 0x186   :  { %3130 = vmatmul.mubr.msk.f32.vlgmr.msra.gmra.mxu0 %vm157_vm0, %v196_v42  ;;  %v415_v42 = vrot.slane %v3703_v31, %v3771_v41 }
 0x187   :  { %3152 = vmatpush3.msra.mxu0 %v3740_v13 }
 0x188   :  { %3153 = vmatprep.subr.mxu0 %v3742_v14 }
 0x189   :  { %3154 = vmatpush3.msra.mxu0 %v3742_v14 }
 0x18a   :  { %3155 = vmatprep.subr.mxu0 %v3746_v15 }
 0x18b   :  { %3156 = vmatpush3.msra.mxu0 %v3746_v15 }
 0x18c   :  { %3157 = vmatprep.subr.mxu0 %v3750_v16 }
 0x18d   :  { %3158 = vmatpush3.msra.mxu0 %v3750_v16 }
 0x18e   :  { %3162 = vmatprep.subr.mxu0 %v3591_v40 }
 0x246   :  { %v3131_v49 = vpop.f32.mrf.mxu0 }
 0x247   :  { %v279_v50 = vadd.f32 %v3131_v49, %v200_v48 }
 0x248   :  { %v273_v51 = vpop.f32.mrf.mxu0 }
 0x249   :  { %v274_v52 = vadd.f32 %v273_v51, %v200_v48  ;;  %v283_v54 = vmax.f32 %v279_v50, 0.0  ;;  %v152_v50 = vand.u32 127, %v143_v27  ;;  %v139_v51 = vstv %s138_s6 }
 0x24a   :  { %vm3801_vm4 = vcmp.lt.s32.totalorder %v3698_v29, %v139_v51 }
 0x24b   :  { %v282_v53 = vmax.f32 %v274_v52, 0.0  ;;  %vm153_vm5 = vcmp.lt.s32.totalorder %v152_v50, %v139_v51 }
 0x24c   :  { %vm3807_vm6 = vmand %vm3801_vm4, %vm153_vm5  ;;  %vm2446_vm5 = vcmp.lt.s32.totalorder %v3698_v29, 6 }
 0x24d   :  { %3148 = vmatprep.mubr.msk.f32.mxu1 %vm288_vm1, %v282_v53  ;;  %v142_v53 = vstv %s2968_s8 }
 0x24e   :  { %3149 = vmatmul.mubr.msk.f32.vlgmr.msra.gmra.mxu1 %vm288_vm1, %v283_v54  ;;  %vm3812_vm7 = vcmp.lt.s32.totalorder %v3698_v29, %v142_v53  ;;  %vm154_vm8 = vcmp.lt.s32.totalorder %v152_v50, %v142_v53 }
 0x24f   :  { %3179 = vmatprep.mubr.msk.f32.mxu1 %vm3592_vm2, %v3591_v40  ;;  %vm3821_vm9 = vmand %vm3812_vm7, %vm154_vm8 }
 0x30e   :  { %v3150_v57 = vpop.f32.mrf.mxu1 }
 0x30f   :  { %v367_v58 = vadd.f32 %v3150_v57, %v287_v56 }
 0x310   :  { %v361_v59 = vpop.f32.mrf.mxu1 }
 0x311   :  { %v371_v60 = vmul.f32 0.5, %v367_v58  ;;  %v362_v61 = vadd.f32 %v361_v59, %v287_v56 }
 0x313   :  { %v3727_v62 = vadd.f32 %v371_v60, %v3687_v1  ;;  %v370_v63 = vmul.f32 0.5, %v362_v61 }
 0x315   :  { %v3730_v2 = vadd.f32 %v370_v63, %v3685_v0  ;;  %v377_v3 = vsel %vm157_vm0, %v3727_v62, 0.0 }
 0x316   :  { %378 = vadd.xlane.f32.xlu1 %v377_v3 }
 0x317   :  { %v374_v4 = vsel %vm157_vm0, %v3730_v2, 0.0 }
 0x318   :  { %375 = vadd.xlane.f32.xlu0 %v374_v4 }
 0x39f   :  { %v379_v5 = vpop.xlane.xlu1 %378 }
 0x3a0   :  { %v381_v6 = vmul.f32 0.03125, %v379_v5 }
 0x3a1   :  { %v376_v7 = vpop.xlane.xlu0 %375 }
 0x3a2   :  { %v383_v8 = vsub.f32 %v3727_v62, %v381_v6  ;;  %v380_v9 = vmul.f32 0.03125, %v376_v7 }
 0x3a4   :  { %v382_v1 = vsub.f32 %v3730_v2, %v380_v9  ;;  %v385_v10 = vmul.f32 %v383_v8, %v383_v8 }
 0x3a6   :  { %v389_v0 = vsel %vm157_vm0, %v385_v10, 0.0  ;;  %v384_v11 = vmul.f32 %v382_v1, %v382_v1 }
 0x3a7   :  { %390 = vadd.xlane.f32.xlu1 %v389_v0 }
 0x3a8   :  { %v386_v12 = vsel %vm157_vm0, %v384_v11, 0.0 }
 0x3a9   :  { %387 = vadd.xlane.f32.xlu0 %v386_v12 }
 0x430   :  { %v391_v17 = vpop.xlane.xlu1 %390 }
 0x431   :  { %v393_v18 = vmul.f32 0.03125, %v391_v17 }
 0x432   :  { %v388_v19 = vpop.xlane.xlu0 %387 }
 0x433   :  { %v395_v20 = vadd.f32 1e-05, %v393_v18  ;;  %v392_v21 = vmul.f32 0.03125, %v388_v19 }
 0x435   :  { %3342 = vrsqrt.f32 %v395_v20  ;;  %v394_v22 = vadd.f32 1e-05, %v392_v21 }
 0x437   :  { %3344 = vrsqrt.f32 %v394_v22 }
 0x442   :  { %v3343_v24 = vpop.eup %3342 }
 0x443   :  { %v399_v28 = vmul.f32 %v3343_v24, %v383_v8 }
 0x444   :  { %v3345_v33 = vpop.eup %3344 }
 0x445   :  { %v398_v34 = vmul.f32 %v3345_v33, %v382_v1  ;;  %v405_v35 = vmul.f32 %v403_v25, %v399_v28  ;;  %v3843_v33 = vsel %vm3801_vm4, 1.0, %v3591_v40 }
 0x447   :  { %v404_v37 = vmul.f32 %v403_v25, %v398_v34  ;;  %v411_v39 = vadd.f32 %v409_v36, %v405_v35 }
 0x449   :  { %v410_v38 = vadd.f32 %v409_v36, %v404_v37  ;;  %v3849_v37 = vsel %vm3812_vm7, 1.0, %v3591_v40  ;;  %vm2467_vm7 = vcmp.lt.s32.totalorder %v3698_v29, 5 }
 0x44b   :  { %3159 = vmatprep.mubr.msk.f32.mxu0 %vm157_vm0, %v410_v38 }
 0x44c   :  { %3160 = vmatmul.mubr.msk.f32.vlgmr.msra.gmra.mxu0 %vm157_vm0, %v411_v39 }
 0x44d   :  { %3164 = vmatprep.mubr.msk.f32.mxu0 %vm3592_vm2, %v3591_v40 }
 0x50c   :  { %v3161_v43 = vpop.f32.mrf.mxu0 }
 0x50d   :  { %v3779_v44 = vadd.f32 %v3161_v43, %v415_v42 }
 0x50e   :  { %v488_v45 = vpop.f32.mrf.mxu0 }
 0x50f   :  { %v3781_v46 = vadd.f32 %v488_v45, %v415_v42  ;;  %576 = vrot.lane.b32.xlu1 %v3779_v44, %s3593_s5 }
 0x511   :  { %498 = vrot.lane.b32.xlu0 %v3781_v46, %s3593_s5 }
 0x581   :  { %v577_v49 = vpop.permute.xlu1 %576 }
 0x583   :  { %v499_v48 = vpop.permute.xlu0 %498 }
 0x584   :  { %3163 = vmatpush3.xpose.msk.msra.mxu0 %vm500_vm3, %v499_v48 }
 0x585   :  { %3167 = vmatprep.subr.mxu0 %v3591_v40 }
 0x587   :  { %3165 = vmatmul.mubr.msk.f32.vlgmr.msra.gmra.mxu0 %vm500_vm3, %v3781_v46 }
 0x588   :  { %3168 = vmatpush3.xpose.msk.msra.mxu0 %vm500_vm3, %v577_v49  ;;  %3169 = vmatprep.mubr.msk.f32.mxu0 %vm3592_vm2, %v3591_v40 }
 0x589   :  { %3172 = vmatprep.subr.mxu0 %v3591_v40 }
 0x58b   :  { %3170 = vmatmul.mubr.msk.f32.vlgmr.msra.gmra.mxu0 %vm500_vm3, %v3779_v44 }
 0x58c   :  { %3174 = vmatprep.mubr.msk.f32.mxu0 %vm3592_vm2, %v3591_v40 }
 0x647   :  { %v571_v54 = vpop.f32.mrf.mxu0 }
 0x648   :  { %v652_v57 = vmul.f32 0.35355338, %v571_v54 }
 0x649   :  { %v3166_v27 = vpop.f32.mrf.mxu0 }
 0x64a   :  { %v654_v59 = vsel %vm3807_vm6, %v652_v57, -1e+30 }
 0x64b   :  { %v648_v60 = vpop.f32.mrf.mxu0  ;;  %v656_v61 = vsel %vm500_vm3, %v654_v59, -inf }
 0x64c   :  { %v653_v3 = vmul.f32 0.35355338, %v648_v60  ;;  %657 = vmax.xlane.f32.xlu1 %v656_v61 }
 0x64d   :  { %v3171_v4 = vpop.f32.mrf.mxu0 }
 0x64e   :  { %v655_v5 = vsel %vm3821_vm9, %v653_v3, -1e+30 }
 0x64f   :  { %v659_v6 = vsel %vm500_vm3, %v655_v5, -inf }
 0x650   :  { %660 = vmax.xlane.f32.xlu0 %v659_v6 }
 0x65d   :  { %756 = vrot.lane.b32.xlu1 %v3779_v44, %s3594_s10 }
 0x661   :  { %834 = vrot.lane.b32.xlu1 %v3781_v46, %s3595_s11 }
 0x665   :  { %912 = vrot.lane.b32.xlu1 %v3779_v44, %s3595_s11 }
 0x6d5   :  { %v658_v7 = vpop.xlane.xlu1 %657 }
 0x6d6   :  { %v662_v8 = vsub.f32 %v654_v59, %v658_v7 }
 0x6d8   :  { %v664_v9 = vmul.f32 1.442695, %v662_v8 }
 0x6d9   :  { %v757_v1 = vpop.permute.xlu1 %756  ;;  %v661_v10 = vpop.xlane.xlu0 %660 }
 0x6da   :  { %3346 = vpow2.f32 %v664_v9  ;;  %v663_v0 = vsub.f32 %v655_v5, %v661_v10  ;;  %3178 = vmatpush3.msra.mxu1 %v757_v1 }
 0x6db   :  { %3187 = vmatprep.subr.mxu1 %v3591_v40 }
 0x6dc   :  { %v666_v11 = vmul.f32 1.442695, %v663_v0 }
 0x6dd   :  { %v835_v20 = vpop.permute.xlu1 %834 }
 0x6de   :  { %3348 = vpow2.f32 %v666_v11 }
 0x6e1   :  { %v913_v21 = vpop.permute.xlu1 %912 }
 0x6e7   :  { %v3347_v12 = vpop.eup %3346 }
 0x6e8   :  { %v668_v17 = vsel %vm500_vm3, %v3347_v12, 0.0 }
 0x6e9   :  { %669 = vadd.xlane.f32.xlu0 %v668_v17 }
 0x6eb   :  { %v3349_v18 = vpop.eup %3348 }
 0x6ec   :  { %v671_v19 = vsel %vm500_vm3, %v3349_v18, 0.0 }
 0x6ed   :  { %672 = vadd.xlane.f32.xlu1 %v671_v19 }
 0x6fe   :  { %910 = vrot.lane.b32.xlu1 %v3779_v44, %s3596_s12 }
 0x6ff   :  { %680 = vrot.lane.b32.xlu0 %v3781_v46, %s3594_s10 }
 0x703   :  { %832 = vrot.lane.b32.xlu0 %v3781_v46, %s3596_s12 }
 0x772   :  { %v670_v22 = vpop.xlane.xlu0 %669 }
 0x773   :  { %3350 = vrcp.f32 %v670_v22 }
 0x776   :  { %v673_v24 = vpop.xlane.xlu1 %672  ;;  %v681_v25 = vpop.permute.xlu0 %680 }
 0x777   :  { %3352 = vrcp.f32 %v673_v24  ;;  %3173 = vmatpush3.msra.mxu0 %v681_v25 }
 0x778   :  { %3182 = vmatprep.subr.mxu0 %v3591_v40 }
 0x77a   :  { %v833_v42 = vpop.permute.xlu0 %832  ;;  %v911_v43 = vpop.permute.xlu1 %910 }
 0x780   :  { %v3351_v28 = vpop.eup %3350 }
 0x781   :  { %v675_v34 = vmul.f32 %v3351_v28, %v3347_v12 }
 0x783   :  { %v678_v35 = vmul.f32 %v3843_v33, %v675_v34 }
 0x784   :  { %v3353_v36 = vpop.eup %3352 }
 0x785   :  { %3175 = vmatmul.mubr.msk.f32.vlgmr.msra.gmra.mxu0 %vm500_vm3, %v678_v35  ;;  %v677_v38 = vmul.f32 %v3353_v36, %v3349_v18 }
 0x786   :  { %3183 = vmatpush3.xpose.msk.msra.mxu0 %vm500_vm3, %v835_v20  ;;  %3184 = vmatprep.mubr.msk.f32.mxu0 %vm3592_vm2, %v3591_v40 }
 0x787   :  { %v679_v39 = vmul.f32 %v3849_v37, %v677_v38  ;;  %3192 = vmatprep.subr.mxu0 %v3591_v40 }
 0x789   :  { %3180 = vmatmul.mubr.msk.f32.vlgmr.msra.gmra.mxu1 %vm500_vm3, %v679_v39  ;;  %3185 = vmatmul.mubr.msk.f32.vlgmr.msra.gmra.mxu0 %vm500_vm3, %v833_v42 }
 0x78a   :  { %3188 = vmatpush3.xpose.msk.msra.mxu1 %vm500_vm3, %v913_v21  ;;  %3189 = vmatprep.mubr.msk.f32.mxu1 %vm3592_vm2, %v3591_v40 }
 0x78b   :  { %3197 = vmatprep.subr.mxu1 %v3591_v40  ;;  %3194 = vmatprep.mubr.msk.f32.mxu0 %vm3592_vm2, %v3591_v40 }
 0x78d   :  { %3190 = vmatmul.mubr.msk.f32.vlgmr.msra.gmra.mxu1 %vm500_vm3, %v911_v43 }
 0x78e   :  { %3199 = vmatprep.mubr.msk.f32.mxu1 %vm3592_vm2, %v3591_v40 }
 0x845   :  { %v3868_v45 = vpop.f32.mrf.mxu0 }
 0x847   :  { %v3176_v48 = vpop.f32.mrf.mxu0 }
 0x849   :  { %v3870_v49 = vpop.f32.mrf.mxu1  ;;  %v906_v50 = vpop.f32.mrf.mxu0 }
 0x84a   :  { %v988_v51 = vmul.f32 0.35355338, %v906_v50 }
 0x84b   :  { %v3181_v52 = vpop.f32.mrf.mxu1  ;;  %v3186_v53 = vpop.f32.mrf.mxu0 }
 0x84c   :  { %v990_v54 = vsel %vm3807_vm6, %v988_v51, -1e+30 }
 0x84d   :  { %v984_v57 = vpop.f32.mrf.mxu1  ;;  %v992_v58 = vsel %vm500_vm3, %v990_v54, -inf }
 0x84e   :  { %v989_v27 = vmul.f32 0.35355338, %v984_v57  ;;  %993 = vmax.xlane.f32.xlu0 %v992_v58 }
 0x84f   :  { %v3191_v59 = vpop.f32.mrf.mxu1 }
 0x850   :  { %v991_v60 = vsel %vm3821_vm9, %v989_v27, -1e+30 }
 0x851   :  { %v995_v61 = vsel %vm500_vm3, %v991_v60, -inf }
 0x852   :  { %996 = vmax.xlane.f32.xlu1 %v995_v61 }
 0x863   :  { %1092 = vrot.lane.b32.xlu1 %v3779_v44, %s3597_s13 }
 0x867   :  { %1169 = vrot.lane.b32.xlu1 %v3746_v15, %s3598_s14 }
 0x86b   :  { %1254 = vrot.lane.b32.xlu1 %v3750_v16, %s3598_s14 }
 0x86f   :  { %1418 = vrot.lane.b32.xlu1 %v3779_v44, %s3599_s15 }
 0x873   :  { %1416 = vrot.lane.b32.xlu1 %v3779_v44, %s3600_s16 }
 0x8d7   :  { %v994_v3 = vpop.xlane.xlu0 %993 }
 0x8d8   :  { %v998_v4 = vsub.f32 %v990_v54, %v994_v3 }
 0x8da   :  { %v1000_v5 = vmul.f32 1.442695, %v998_v4 }
 0x8db   :  { %v997_v6 = vpop.xlane.xlu1 %996 }
 0x8dc   :  { %3354 = vpow2.f32 %v1000_v5  ;;  %v999_v7 = vsub.f32 %v991_v60, %v997_v6 }
 0x8de   :  { %v1002_v8 = vmul.f32 1.442695, %v999_v7 }
 0x8df   :  { %v1093_v9 = vpop.permute.xlu1 %1092 }
 0x8e0   :  { %3356 = vpow2.f32 %v1002_v8  ;;  %3198 = vmatpush3.msra.mxu1 %v1093_v9 }
 0x8e3   :  { %v1170_v15 = vpop.permute.xlu1 %1169 }
 0x8e7   :  { %v1255_v1 = vpop.permute.xlu1 %1254 }
 0x8e8   :  { %3207 = vmatprep.subr.mxu1 %v1255_v1 }
 0x8e9   :  { %v3355_v16 = vpop.eup %3354 }
 0x8ea   :  { %v1004_v10 = vsel %vm500_vm3, %v3355_v16, 0.0 }
 0x8eb   :  { %1005 = vadd.xlane.f32.xlu0 %v1004_v10  ;;  %v1419_v28 = vpop.permute.xlu1 %1418 }
 0x8ed   :  { %v3357_v0 = vpop.eup %3356 }
 0x8ee   :  { %v1007_v11 = vsel %vm500_vm3, %v3357_v0, 0.0 }
 0x8ef   :  { %1008 = vadd.xlane.f32.xlu0 %v1007_v11  ;;  %v1417_v34 = vpop.permute.xlu1 %1416 }
 0x905   :  { %1016 = vrot.lane.b32.xlu0 %v3781_v46, %s3597_s13 }
 0x909   :  { %1340 = vrot.lane.b32.xlu0 %v3781_v46, %s3599_s15 }
 0x90d   :  { %1338 = vrot.lane.b32.xlu0 %v3781_v46, %s3600_s16 }
 0x974   :  { %v1006_v12 = vpop.xlane.xlu0 %1005 }
 0x975   :  { %3358 = vrcp.f32 %v1006_v12 }
 0x978   :  { %v1009_v17 = vpop.xlane.xlu0 %1008 }
 0x979   :  { %3360 = vrcp.f32 %v1009_v17 }
 0x97c   :  { %v1017_v18 = vpop.permute.xlu0 %1016 }
 0x97d   :  { %3193 = vmatpush3.msra.mxu0 %v1017_v18 }
 0x97e   :  { %3202 = vmatprep.subr.mxu0 %v1170_v15 }
 0x980   :  { %v1341_v36 = vpop.permute.xlu0 %1340 }
 0x982   :  { %v3359_v19 = vpop.eup %3358 }
 0x983   :  { %v1011_v20 = vmul.f32 %v3359_v19, %v3355_v16 }
 0x984   :  { %v1339_v43 = vpop.permute.xlu0 %1338 }
 0x985   :  { %v1014_v21 = vmul.f32 %v3843_v33, %v1011_v20 }
 0x986   :  { %v3361_v22 = vpop.eup %3360 }
 0x987   :  { %3195 = vmatmul.mubr.msk.f32.vlgmr.msra.gmra.mxu0 %vm500_vm3, %v1014_v21  ;;  %v1013_v24 = vmul.f32 %v3361_v22, %v3357_v0 }
 0x988   :  { %3203 = vmatpush3.msra.mxu0 %v1170_v15 }
 0x989   :  { %v1015_v25 = vmul.f32 %v3849_v37, %v1013_v24  ;;  %3212 = vmatprep.subr.mxu0 %v3591_v40 }
 0x98b   :  { %3200 = vmatmul.mubr.msk.f32.vlgmr.msra.gmra.mxu1 %vm500_vm3, %v1015_v25 }
 0x98c   :  { %3209 = vmatprep.mubr.msk.f32.mxu1 %vm500_vm3, %v3868_v45  ;;  %3208 = vmatpush3.msra.mxu1 %v1255_v1 }
 0x98d   :  { %3217 = vmatprep.subr.mxu1 %v3591_v40 }
 0x98f   :  { %3210 = vmatmul.mubr.msk.f32.vlgmr.msra.gmra.mxu1 %vm500_vm3, %v3870_v49 }
 0x990   :  { %3218 = vmatpush3.xpose.msk.msra.mxu1 %vm500_vm3, %v1419_v28  ;;  %3219 = vmatprep.mubr.msk.f32.mxu1 %vm3592_vm2, %v3591_v40 }
 0x991   :  { %3227 = vmatprep.subr.mxu1 %v3591_v40 }
 0x993   :  { %3220 = vmatmul.mubr.msk.f32.vlgmr.msra.gmra.mxu1 %vm500_vm3, %v1417_v34 }
 0x994   :  { %3229 = vmatprep.mubr.msk.f32.mxu1 %vm3592_vm2, %v3591_v40 }
 0xa47   :  { %v1088_v35 = vpop.f32.mrf.mxu0 }
 0xa48   :  { %3204 = vmatprep.mubr.msk.f32.mxu0 %vm500_vm3, %v1088_v35 }
 0xa49   :  { %v3196_v38 = vpop.f32.mrf.mxu0 }
 0xa4b   :  { %v1164_v39 = vpop.f32.mrf.mxu1 }
 0xa4c   :  { %3205 = vmatmul.mubr.msk.f32.vlgmr.msra.gmra.mxu0 %vm500_vm3, %v1164_v39 }
 0xa4d   :  { %3213 = vmatpush3.xpose.msk.msra.mxu0 %vm500_vm3, %v1341_v36  ;;  %v3201_v42 = vpop.f32.mrf.mxu1  ;;  %3214 = vmatprep.mubr.msk.f32.mxu0 %vm3592_vm2, %v3591_v40 }
 0xa4e   :  { %3222 = vmatprep.subr.mxu0 %v3591_v40 }
 0xa4f   :  { %v3913_v45 = vpop.f32.mrf.mxu1 }
 0xa50   :  { %3215 = vmatmul.mubr.msk.f32.vlgmr.msra.gmra.mxu0 %vm500_vm3, %v1339_v43 }
 0xa51   :  { %v3916_v48 = vpop.f32.mrf.mxu1  ;;  %3224 = vmatprep.mubr.msk.f32.mxu0 %vm3592_vm2, %v3591_v40 }
 0xa53   :  { %v1490_v49 = vpop.f32.mrf.mxu1 }
 0xa54   :  { %v1495_v50 = vmul.f32 0.35355338, %v1490_v49 }
 0xa55   :  { %v3221_v51 = vpop.f32.mrf.mxu1 }
 0xa56   :  { %v1497_v52 = vsel %vm3821_vm9, %v1495_v50, -1e+30 }
 0xa57   :  { %v1501_v53 = vsel %vm500_vm3, %v1497_v52, -inf }
 0xa58   :  { %1502 = vmax.xlane.f32.xlu1 %v1501_v53 }
 0xa69   :  { %1598 = vrot.lane.b32.xlu1 %v3779_v44, %s3601_s17 }
 0xa6d   :  { %1675 = vrot.lane.b32.xlu1 %v3742_v14, %s3598_s14 }
 0xa71   :  { %1763 = vrot.lane.b32.xlu1 %v3781_v46, %s3602_s18 }
 0xa75   :  { %1761 = vrot.lane.b32.xlu1 %v3781_v46, %s3603_s2 }
 0xae1   :  { %v1503_v54 = vpop.xlane.xlu1 %1502 }
 0xae2   :  { %v1505_v58 = vsub.f32 %v1497_v52, %v1503_v54 }
 0xae4   :  { %v1508_v27 = vmul.f32 1.442695, %v1505_v58 }
 0xae5   :  { %v1599_v57 = vpop.permute.xlu1 %1598 }
 0xae6   :  { %3228 = vmatpush3.msra.mxu1 %v1599_v57  ;;  %3362 = vpow2.f32 %v1508_v27 }
 0xae7   :  { %3237 = vmatprep.subr.mxu1 %v3591_v40 }
 0xae9   :  { %v1676_v16 = vpop.permute.xlu1 %1675 }
 0xaed   :  { %v1764_v17 = vpop.permute.xlu1 %1763 }
 0xaf1   :  { %v1762_v19 = vpop.permute.xlu1 %1761 }
 0xaf3   :  { %v3363_v6 = vpop.eup %3362 }
 0xaf4   :  { %v1513_v7 = vsel %vm500_vm3, %v3363_v6, 0.0 }
 0xb0c   :  { %v3932_v59 = vpop.f32.mrf.mxu0 }
 0xb0d   :  { %v1335_v54 = vadd.f32 %v3913_v45, %v3932_v59 }
 0xb0e   :  { %v3934_v60 = vpop.f32.mrf.mxu0 }
 0xb0f   :  { %v1330_v58 = vadd.f32 %v3916_v48, %v3934_v60 }
 0xb10   :  { %v1412_v14 = vpop.f32.mrf.mxu0 }
 0xb11   :  { %v1494_v61 = vmul.f32 0.35355338, %v1412_v14 }
 0xb12   :  { %v3216_v3 = vpop.f32.mrf.mxu0 }
 0xb13   :  { %v1496_v4 = vsel %vm3807_vm6, %v1494_v61, -1e+30 }
 0xb14   :  { %v1498_v5 = vsel %vm500_vm3, %v1496_v4, -inf }
 0xb15   :  { %1499 = vmax.xlane.f32.xlu0 %v1498_v5 }
 0xb19   :  { %1514 = vadd.xlane.f32.xlu0 %v1513_v7 }
 0xb9e   :  { %v1500_v8 = vpop.xlane.xlu0 %1499 }
 0xb9f   :  { %v1504_v9 = vsub.f32 %v1496_v4, %v1500_v8 }
 0xba1   :  { %v1506_v15 = vmul.f32 1.442695, %v1504_v9 }
 0xba2   :  { %v1515_v1 = vpop.xlane.xlu0 %1514 }
 0xba3   :  { %3364 = vpow2.f32 %v1506_v15 }
 0xba4   :  { %3366 = vrcp.f32 %v1515_v1 }
 0xbb0   :  { %v3365_v10 = vpop.eup %3364 }
 0xbb1   :  { %v3367_v0 = vpop.eup %3366  ;;  %v1510_v11 = vsel %vm500_vm3, %v3365_v10, 0.0 }
 0xbb2   :  { %1511 = vadd.xlane.f32.xlu0 %v1510_v11  ;;  %v1519_v12 = vmul.f32 %v3367_v0, %v3363_v6 }
 0xbb4   :  { %v1521_v18 = vmul.f32 %v3849_v37, %v1519_v12 }
 0xbb6   :  { %3230 = vmatmul.mubr.msk.f32.vlgmr.msra.gmra.mxu1 %vm500_vm3, %v1521_v18 }
 0xbb7   :  { %3238 = vmatpush3.xpose.msk.msra.mxu1 %vm500_vm3, %v1764_v17  ;;  %3239 = vmatprep.mubr.msk.f32.mxu1 %vm3592_vm2, %v3591_v40 }
 0xbb8   :  { %3247 = vmatprep.subr.mxu1 %v3591_v40 }
 0xbba   :  { %3240 = vmatmul.mubr.msk.f32.vlgmr.msra.gmra.mxu1 %vm500_vm3, %v1762_v19 }
 0xbbb   :  { %3249 = vmatprep.mubr.msk.f32.mxu1 %vm3592_vm2, %v3591_v40 }
 0xbc8   :  { %1522 = vrot.lane.b32.xlu0 %v3781_v46, %s3601_s17 }
 0xbcc   :  { %1841 = vrot.lane.b32.xlu0 %v3779_v44, %s3602_s18 }
 0xbd0   :  { %1839 = vrot.lane.b32.xlu0 %v3779_v44, %s3603_s2 }
 0xc3b   :  { %v1512_v20 = vpop.xlane.xlu0 %1511 }
 0xc3c   :  { %3368 = vrcp.f32 %v1512_v20 }
 0xc3f   :  { %v1523_v21 = vpop.permute.xlu0 %1522 }
 0xc40   :  { %3223 = vmatpush3.msra.mxu0 %v1523_v21 }
 0xc41   :  { %3232 = vmatprep.subr.mxu0 %v1676_v16 }
 0xc43   :  { %v1842_v50 = vpop.permute.xlu0 %1841 }
 0xc47   :  { %v1840_v56 = vpop.permute.xlu0 %1839 }
 0xc49   :  { %v3369_v22 = vpop.eup %3368 }
 0xc4a   :  { %v1517_v24 = vmul.f32 %v3369_v22, %v3365_v10 }
 0xc4c   :  { %v1520_v25 = vmul.f32 %v3843_v33, %v1517_v24 }
 0xc4e   :  { %3225 = vmatmul.mubr.msk.f32.vlgmr.msra.gmra.mxu0 %vm500_vm3, %v1520_v25  ;;  %v3993_v25 = vsub.s32 7, %v3698_v29 }
 0xc4f   :  { %3233 = vmatpush3.msra.mxu0 %v1676_v16 }
 0xc50   :  { %3242 = vmatprep.subr.mxu0 %v3591_v40 }
 0xc76   :  { %v1670_v28 = vpop.f32.mrf.mxu1 }
 0xc78   :  { %v3231_v34 = vpop.f32.mrf.mxu1 }
 0xc7a   :  { %v1835_v35 = vpop.f32.mrf.mxu1 }
 0xc7b   :  { %v1917_v36 = vmul.f32 0.35355338, %v1835_v35  ;;  %v2189_v35 = vrot.slane %v3703_v31, %v3993_v25 }
 0xc7c   :  { %v3241_v38 = vpop.f32.mrf.mxu1 }
 0xc7d   :  { %v1919_v39 = vsel %vm3807_vm6, %v1917_v36, -1e+30 }
 0xc7e   :  { %v1921_v42 = vsel %vm500_vm3, %v1919_v39, -inf }
 0xc7f   :  { %1922 = vmax.xlane.f32.xlu1 %v1921_v42 }
 0xc90   :  { %1945 = vrot.lane.b32.xlu1 %v3781_v46, %s3604_s19 }
 0xc94   :  { %2098 = vrot.lane.b32.xlu1 %v3740_v13, %s3598_s14 }
 0xd08   :  { %v1923_v43 = vpop.xlane.xlu1 %1922 }
 0xd09   :  { %v1927_v13 = vsub.f32 %v1919_v39, %v1923_v43 }
 0xd0b   :  { %v1929_v53 = vmul.f32 1.442695, %v1927_v13 }
 0xd0c   :  { %v1946_v49 = vpop.permute.xlu1 %1945 }
 0xd0d   :  { %3248 = vmatpush3.msra.mxu1 %v1946_v49  ;;  %3370 = vpow2.f32 %v1929_v53 }
 0xd0e   :  { %v1594_v51 = vpop.f32.mrf.mxu0 }
 0xd0f   :  { %3234 = vmatprep.mubr.msk.f32.mxu0 %vm500_vm3, %v1594_v51 }
 0xd10   :  { %v3226_v52 = vpop.f32.mrf.mxu0  ;;  %3235 = vmatmul.mubr.msk.f32.vlgmr.msra.gmra.mxu0 %vm500_vm3, %v1670_v28  ;;  %v2099_v0 = vpop.permute.xlu1 %2098 }
 0xd11   :  { %3243 = vmatpush3.xpose.msk.msra.mxu0 %vm500_vm3, %v1842_v50  ;;  %3244 = vmatprep.mubr.msk.f32.mxu0 %vm3592_vm2, %v3591_v40 }
 0xd12   :  { %3252 = vmatprep.subr.mxu0 %v3591_v40  ;;  %3257 = vmatprep.subr.mxu1 %v2099_v0 }
 0xd14   :  { %3245 = vmatmul.mubr.msk.f32.vlgmr.msra.gmra.mxu0 %vm500_vm3, %v1840_v56 }
 0xd15   :  { %3254 = vmatprep.mubr.msk.f32.mxu0 %vm3592_vm2, %v3591_v40  ;;  %vm2389_vm2 = vcmp.lt.s32.totalorder %v3698_v29, 1 }
 0xd1a   :  { %v3371_v8 = vpop.eup %3370 }
 0xd1b   :  { %v1933_v9 = vsel %vm500_vm3, %v3371_v8, 0.0 }
 0xdd0   :  { %v3236_v57 = vpop.f32.mrf.mxu0 }
 0xdd1   :  { %v1760_v27 = vadd.f32 %v3236_v57, %v1335_v54 }
 0xdd2   :  { %v1750_v14 = vpop.f32.mrf.mxu0 }
 0xdd3   :  { %v1759_v61 = vadd.f32 %v1750_v14, %v1330_v58  ;;  %v4013_v14 = vld [vmem:[#allocation13 + $0x10] sm:$0xff] }
 0xdd4   :  { %v1913_v3 = vpop.f32.mrf.mxu0 }
 0xdd5   :  { %v1918_v4 = vmul.f32 0.35355338, %v1913_v3  ;;  %v4021_v3 = vld [vmem:[#allocation13] sm:$0xff] }
 0xdd6   :  { %v3246_v5 = vpop.f32.mrf.mxu0 }
 0xdd7   :  { %v1920_v6 = vsel %vm3821_vm9, %v1918_v4, -1e+30 }
 0xdd8   :  { %v1924_v7 = vsel %vm500_vm3, %v1920_v6, -inf }
 0xdd9   :  { %1925 = vmax.xlane.f32.xlu0 %v1924_v7 }
 0xddd   :  { %1934 = vadd.xlane.f32.xlu0 %v1933_v9 }
 0xe62   :  { %v1926_v45 = vpop.xlane.xlu0 %1925 }
 0xe63   :  { %v1928_v59 = vsub.f32 %v1920_v6, %v1926_v45  ;;  %v4027_v45 = vld [vmem:[#allocation7 + $0x8] sm:$0xff] }
 0xe65   :  { %v1931_v15 = vmul.f32 1.442695, %v1928_v59  ;;  %v2221_v59 = vrot.slane %v4027_v45, %v3701_v30 }
 0xe66   :  { %v1935_v48 = vpop.xlane.xlu0 %1934 }
 0xe67   :  { %3372 = vpow2.f32 %v1931_v15 }
 0xe68   :  { %3374 = vrcp.f32 %v1935_v48 }
 0xe74   :  { %v3373_v60 = vpop.eup %3372 }
 0xe75   :  { %v3375_v1 = vpop.eup %3374  ;;  %v1936_v16 = vsel %vm500_vm3, %v3373_v60, 0.0 }
 0xe76   :  { %1937 = vadd.xlane.f32.xlu0 %v1936_v16  ;;  %v1940_v63 = vmul.f32 %v3375_v1, %v3371_v8  ;;  %v2227_v1 = vrot.slane %v4027_v45, %v3706_v32 }
 0xe78   :  { %v1943_v10 = vmul.f32 %v3843_v33, %v1940_v63 }
 0xe7a   :  { %3250 = vmatmul.mubr.msk.f32.vlgmr.msra.gmra.mxu1 %vm500_vm3, %v1943_v10 }
 0xe7b   :  { %3258 = vmatpush3.msra.mxu1 %v2099_v0 }
 0xe8c   :  { %2021 = vrot.lane.b32.xlu0 %v3779_v44, %s3604_s19 }
 0xeff   :  { %v1938_v11 = vpop.xlane.xlu0 %1937 }
 0xf00   :  { %3376 = vrcp.f32 %v1938_v11 }
 0xf03   :  { %v2022_v12 = vpop.permute.xlu0 %2021 }
 0xf04   :  { %3253 = vmatpush3.msra.mxu0 %v2022_v12 }
 0xf0d   :  { %v3377_v17 = vpop.eup %3376 }
 0xf0e   :  { %v1942_v18 = vmul.f32 %v3377_v17, %v3373_v60 }
 0xf10   :  { %v1944_v19 = vmul.f32 %v3849_v37, %v1942_v18  ;;  %v2235_v18 = vrot.slane %v4027_v45, %v3715_v47 }
 0xf12   :  { %3255 = vmatmul.mubr.msk.f32.vlgmr.msra.gmra.mxu0 %vm500_vm3, %v1944_v19 }
 0xf3a   :  { %v2017_v20 = vpop.f32.mrf.mxu1 }
 0xf3b   :  { %3259 = vmatprep.mubr.msk.f32.mxu1 %vm500_vm3, %v2017_v20 }
 0xf3c   :  { %v3251_v21 = vpop.f32.mrf.mxu1 }
 0xfd2   :  { %v2093_v22 = vpop.f32.mrf.mxu0 }
 0xfd3   :  { %3260 = vmatmul.mubr.msk.f32.vlgmr.msra.gmra.mxu1 %vm500_vm3, %v2093_v22  ;;  %vm2425_vm3 = vcmp.lt.s32.totalorder %v3698_v29, 7 }
 0xfd4   :  { %v3256_v24 = vpop.f32.mrf.mxu0 }
0x1093   :  { %v3261_v28 = vpop.f32.mrf.mxu1 }
0x1094   :  { %v2183_v34 = vadd.f32 %v3261_v28, %v1760_v27  ;;  %v4011_v27 = vld [vmem:[#allocation13 + $0x18] sm:$0xff] }
0x1095   :  { %v2173_v36 = vpop.f32.mrf.mxu1  ;;  %3262 = vmatprep.subr.mxu0 %v4011_v27 }
0x1096   :  { %v2185_v38 = vadd.f32 %v2183_v34, %v3727_v62  ;;  %v2182_v39 = vadd.f32 %v2173_v36, %v1759_v61  ;;  %3263 = vmatpush3.msra.mxu0 %v4011_v27  ;;  %v4017_v61 = vld [vmem:[#allocation13 + $0x8] sm:$0xff] }
0x1097   :  { %3264 = vmatprep.subr.mxu0 %v4013_v14 }
0x1098   :  { %v3998_v42 = vadd.f32 %v2189_v35, %v2185_v38  ;;  %v2184_v43 = vadd.f32 %v2182_v39, %v3730_v2  ;;  %3265 = vmatpush3.msra.mxu0 %v4013_v14 }
0x1099   :  { %3266 = vmatprep.subr.mxu0 %v4017_v61 }
0x109a   :  { %v4001_v49 = vadd.f32 %v2189_v35, %v2184_v43  ;;  %v2195_v50 = vsel %vm157_vm0, %v3998_v42, 0.0  ;;  %3267 = vmatpush3.msra.mxu0 %v4017_v61 }
0x109b   :  { %2196 = vadd.xlane.f32.xlu0 %v2195_v50  ;;  %3268 = vmatprep.subr.mxu0 %v4021_v3  ;;  %v2339_v50 = vadd.s32 4294967293, %v3698_v29 }
0x109c   :  { %v2192_v51 = vsel %vm157_vm0, %v4001_v49, 0.0  ;;  %3269 = vmatpush3.msra.mxu0 %v4021_v3 }
0x109d   :  { %2193 = vadd.xlane.f32.xlu1 %v2192_v51  ;;  %v2360_v51 = vadd.s32 4294967294, %v3698_v29  ;;  %vm2340_vm10 = vcmp.ge.s32.totalorder %v2339_v50, 0 }
0x109f   :  { %vm2361_vm11 = vcmp.ge.s32.totalorder %v2360_v51, 0 }
0x1124   :  { %v2197_v52 = vpop.xlane.xlu0 %2196 }
0x1125   :  { %v2199_v31 = vmul.f32 0.03125, %v2197_v52  ;;  %v4043_v52 = vld [vmem:[#allocation7 + $0x10] sm:$0xff] }
0x1126   :  { %v2194_v56 = vpop.xlane.xlu1 %2193 }
0x1127   :  { %v2201_v62 = vsub.f32 %v3998_v42, %v2199_v31  ;;  %v2198_v13 = vmul.f32 0.03125, %v2194_v56  ;;  %v2381_v31 = vadd.s32 4294967295, %v3698_v29  ;;  %v2417_v56 = vadd.s32 1, %v3698_v29 }
0x1129   :  { %v2200_v53 = vsub.f32 %v4001_v49, %v2198_v13  ;;  %v2203_v54 = vmul.f32 %v2201_v62, %v2201_v62  ;;  %v4051_v13 = vrot.slane %v4043_v52, %v3771_v41  ;;  %vm2382_vm12 = vcmp.ge.s32.totalorder %v2381_v31, 0 }
0x112a   :  { %vm2419_vm13 = vcmp.lt.s32.totalorder %v2417_v56, 8 }
0x112b   :  { %v2207_v2 = vsel %vm157_vm0, %v2203_v54, 0.0  ;;  %v2202_v57 = vmul.f32 %v2200_v53, %v2200_v53  ;;  %v2438_v54 = vadd.s32 2, %v3698_v29 }
0x112c   :  { %2208 = vadd.xlane.f32.xlu1 %v2207_v2 }
0x112d   :  { %v2204_v58 = vsel %vm157_vm0, %v2202_v57, 0.0  ;;  %v3013_v57 = vsel %vm2340_vm10, 1.0, %v3591_v40  ;;  %vm2440_vm4 = vcmp.lt.s32.totalorder %v2438_v54, 8 }
0x112e   :  { %2205 = vadd.xlane.f32.xlu0 %v2204_v58 }
0x11b5   :  { %v2209_v4 = vpop.xlane.xlu1 %2208 }
0x11b6   :  { %v2211_v5 = vmul.f32 0.03125, %v2209_v4  ;;  %v2459_v4 = vadd.s32 3, %v3698_v29 }
0x11b7   :  { %v2206_v6 = vpop.xlane.xlu0 %2205 }
0x11b8   :  { %v2213_v7 = vadd.f32 1e-05, %v2211_v5  ;;  %v2210_v8 = vmul.f32 0.03125, %v2206_v6  ;;  %v2355_v6 = vrot.slane %v4043_v52, %v3762_v26  ;;  %vm2461_vm6 = vcmp.lt.s32.totalorder %v2459_v4, 8 }
0x11b9   :  { %v3018_v56 = vsel %vm2461_vm6, 1.0, %v3591_v40 }
0x11ba   :  { %3378 = vrsqrt.f32 %v2213_v7  ;;  %v2212_v9 = vadd.f32 1e-05, %v2210_v8  ;;  %v3014_v7 = vsel %vm2361_vm11, 1.0, %v3591_v40 }
0x11bc   :  { %3380 = vrsqrt.f32 %v2212_v9  ;;  %v3015_v9 = vsel %vm2382_vm12, 1.0, %v3591_v40 }
0x11c7   :  { %v3379_v15 = vpop.eup %3378 }
0x11c8   :  { %v2217_v48 = vmul.f32 %v3379_v15, %v2201_v62  ;;  %v4047_v62 = vld [vmem:[#allocation7 + $0x18] sm:$0xff] }
0x11c9   :  { %v3381_v60 = vpop.eup %3380  ;;  %v4062_v58 = vrot.slane %v4047_v62, %v3701_v30 }
0x11ca   :  { %v2216_v16 = vmul.f32 %v3381_v60, %v2200_v53  ;;  %v2223_v63 = vmul.f32 %v2221_v59, %v2217_v48  ;;  %v4055_v53 = vrot.slane %v4043_v52, %v3993_v25  ;;  %v4077_v48 = vrot.slane %v4047_v62, %v3706_v32 }
0x11cc   :  { %v2222_v10 = vmul.f32 %v2221_v59, %v2216_v16  ;;  %v2229_v0 = vadd.f32 %v2227_v1, %v2223_v63  ;;  %v3016_v59 = vsel %vm2419_vm13, 1.0, %v3591_v40 }
0x11ce   :  { %v2228_v11 = vadd.f32 %v2227_v1, %v2222_v10  ;;  %v2231_v17 = vmul.f32 %v3849_v37, %v2229_v0 }
0x11d0   :  { %v2230_v12 = vmul.f32 %v3843_v33, %v2228_v11 }
0x11d2   :  { %3270 = vmatprep.mubr.msk.f32.mxu0 %vm157_vm0, %v2230_v12 }
0x11d3   :  { %3271 = vmatmul.mubr.msk.f32.vlgmr.msra.gmra.mxu0 %vm157_vm0, %v2231_v17 }
0x1293   :  { %v3272_v19 = vpop.f32.mrf.mxu0 }
0x1294   :  { %v2314_v20 = vadd.f32 %v3272_v19, %v2235_v18 }
0x1295   :  { %v2308_v21 = vpop.f32.mrf.mxu0 }
0x1296   :  { %v3012_v22 = vmul.f32 -1.442695, %v2314_v20  ;;  %v2309_v24 = vadd.f32 %v2308_v21, %v2235_v18 }
0x1298   :  { %3382 = vpow2.f32 %v3012_v22  ;;  %v3011_v28 = vmul.f32 -1.442695, %v2309_v24 }
0x129a   :  { %3384 = vpow2.f32 %v3011_v28 }
0x12a5   :  { %v3383_v34 = vpop.eup %3382 }
0x12a6   :  { %v2324_v35 = vadd.f32 1.0, %v3383_v34 }
0x12a7   :  { %v3385_v36 = vpop.eup %3384 }
0x12a8   :  { %3386 = vrcp.f32 %v2324_v35  ;;  %v2323_v38 = vadd.f32 1.0, %v3385_v36  ;;  %v3017_v36 = vsel %vm2440_vm4, 1.0, %v3591_v40  ;;  %v2454_v40 = vrot.slane %v4047_v62, %v3715_v47 }
0x12aa   :  { %3388 = vrcp.f32 %v2323_v38 }
0x12b5   :  { %v3387_v39 = vpop.eup %3386 }
0x12b6   :  { %2333 = vrot.lane.b32.xlu1 %v3387_v39, %s3593_s5 }
0x12b7   :  { %v3389_v43 = vpop.eup %3388 }
0x12b8   :  { %2331 = vrot.lane.b32.xlu0 %v3389_v43, %s3593_s5 }
0x1328   :  { %v2334_v2 = vpop.permute.xlu1 %2333 }
0x1329   :  { %v4065_v5 = vmul.f32 %v2334_v2, %v2314_v20 }
0x132a   :  { %v2332_v8 = vpop.permute.xlu0 %2331 }
0x132b   :  { %v2337_v15 = vmul.f32 %v2332_v8, %v2309_v24  ;;  %v2346_v60 = vrot.slane %v4065_v5, 5  ;;  %v2367_v1 = vrot.slane %v4065_v5, 6  ;;  %v2388_v0 = vrot.slane %v4065_v5, 7 }
0x132c   :  { %v2424_v12 = vrot.slane %v4065_v5, 1  ;;  %v2445_v38 = vrot.slane %v4065_v5, 2  ;;  %v2466_v39 = vrot.slane %v4065_v5, 3 }
0x132d   :  { %v2345_v16 = vrot.slane %v2337_v15, 5  ;;  %v2366_v63 = vrot.slane %v2337_v15, 6  ;;  %v2387_v10 = vrot.slane %v2337_v15, 7  ;;  %v2423_v11 = vrot.slane %v2337_v15, 1 }
0x132e   :  { %v2444_v17 = vrot.slane %v2337_v15, 2  ;;  %v2465_v18 = vrot.slane %v2337_v15, 3 }
0x132f   :  { %v2349_v19 = vsel %vm2347_vm14, %v2346_v60, %v2345_v16  ;;  %v2370_v20 = vsel %vm2368_vm15, %v2367_v1, %v2366_v63  ;;  %v2391_v21 = vsel %vm2389_vm2, %v2388_v0, %v2387_v10  ;;  %v2348_v22 = vsel %vm2347_vm14, %v2345_v16, %v2346_v60 }
0x1330   :  { %v2350_v24 = vmul.f32 %v3013_v57, %v2349_v19  ;;  %v2371_v28 = vmul.f32 %v3014_v7, %v2370_v20  ;;  %v2392_v34 = vmul.f32 %v3015_v9, %v2391_v21  ;;  %v2426_v35 = vsel %vm2425_vm3, %v2423_v11, %v2424_v12 }
0x1331   :  { %v2351_v43 = vmul.f32 %v3013_v57, %v2348_v22  ;;  %v2428_v31 = vmul.f32 %v3016_v59, %v2426_v35  ;;  %v2447_v8 = vsel %vm2446_vm5, %v2444_v17, %v2445_v38  ;;  %v2468_v54 = vsel %vm2467_vm7, %v2465_v18, %v2466_v39 }
0x1332   :  { %v2356_v50 = vmul.f32 %v2355_v6, %v2350_v24  ;;  %v2377_v51 = vmul.f32 %v4051_v13, %v2371_v28  ;;  %v2398_v2 = vmul.f32 %v4055_v53, %v2392_v34  ;;  %v2369_v60 = vsel %vm2368_vm15, %v2366_v63, %v2367_v1 }
0x1333   :  { %v2357_v57 = vmul.f32 %v2355_v6, %v2351_v43  ;;  %v2372_v19 = vmul.f32 %v3014_v7, %v2369_v60  ;;  %v2390_v20 = vsel %vm2389_vm2, %v2387_v10, %v2388_v0  ;;  %v2427_v21 = vsel %vm2425_vm3, %v2424_v12, %v2423_v11 }
0x1334   :  { %v2379_v16 = vadd.f32 %v2377_v51, %v2356_v50  ;;  %v2393_v4 = vmul.f32 %v3015_v9, %v2390_v20  ;;  %v2413_v24 = vmul.f32 %v4062_v58, %v2337_v15  ;;  %v2449_v28 = vmul.f32 %v3017_v36, %v2447_v8 }
0x1335   :  { %v2378_v34 = vmul.f32 %v4051_v13, %v2372_v19  ;;  %v2434_v1 = vmul.f32 %v4077_v48, %v2428_v31  ;;  %v2470_v6 = vmul.f32 %v3018_v56, %v2468_v54  ;;  %v2475_v7 = vrot.slane %v4047_v62, %v3722_v55 }
0x1336   :  { %v2400_v22 = vadd.f32 %v2398_v2, %v2379_v16  ;;  %v2448_v63 = vsel %vm2446_vm5, %v2445_v38, %v2444_v17  ;;  %v2399_v0 = vmul.f32 %v4055_v53, %v2393_v4  ;;  %v2429_v11 = vmul.f32 %v3016_v59, %v2427_v21 }
0x1337   :  { %v2380_v9 = vadd.f32 %v2378_v34, %v2357_v57  ;;  %v2414_v15 = vmul.f32 %v4062_v58, %v4065_v5  ;;  %v2469_v13 = vsel %vm2467_vm7, %v2466_v39, %v2465_v18  ;;  %v2455_v35 = vmul.f32 %v2454_v40, %v2449_v28 }
0x1338   :  { %v2415_v10 = vadd.f32 %v2413_v24, %v2400_v22  ;;  %v2450_v50 = vmul.f32 %v3017_v36, %v2448_v63  ;;  %v2476_v51 = vmul.f32 %v2475_v7, %v2470_v6  ;;  %v2483_v62 = vrot.slane %v4027_v45, %v3722_v55 }
0x1339   :  { %v2401_v43 = vadd.f32 %v2399_v0, %v2380_v9  ;;  %v2435_v31 = vmul.f32 %v4077_v48, %v2429_v11  ;;  %v2471_v53 = vmul.f32 %v3018_v56, %v2469_v13  ;;  %v2521_v9 = vrot.slane %v4027_v45, %v3762_v26 }
0x133a   :  { %v2436_v12 = vadd.f32 %v2434_v1, %v2415_v10  ;;  %v2456_v8 = vmul.f32 %v2454_v40, %v2450_v50 }
0x133b   :  { %v2416_v38 = vadd.f32 %v2414_v15, %v2401_v43  ;;  %v2477_v29 = vmul.f32 %v2475_v7, %v2471_v53 }
0x133c   :  { %v2457_v17 = vadd.f32 %v2455_v35, %v2436_v12 }
0x133d   :  { %v2437_v2 = vadd.f32 %v2435_v31, %v2416_v38 }
0x133e   :  { %v2478_v59 = vadd.f32 %v2476_v51, %v2457_v17 }
0x133f   :  { %v2458_v5 = vadd.f32 %v2456_v8, %v2437_v2  ;;  %v2541_v2 = vrot.slane %v4027_v45, %v3771_v41 }
0x1340   :  { %v2484_v58 = vadd.f32 %v2483_v62, %v2478_v59 }
0x1341   :  { %v2479_v39 = vadd.f32 %v2477_v29, %v2458_v5 }
0x1342   :  { %v2486_v18 = vsel %vm157_vm0, %v2484_v58, 0.0 }
0x1343   :  { %2487 = vadd.xlane.f32.xlu1 %v2486_v18  ;;  %v2485_v36 = vadd.f32 %v2483_v62, %v2479_v39 }
0x1345   :  { %v2489_v54 = vsel %vm157_vm0, %v2485_v36, 0.0 }
0x1346   :  { %2490 = vadd.xlane.f32.xlu0 %v2489_v54 }
0x13cc   :  { %v2488_v60 = vpop.xlane.xlu1 %2487 }
0x13cd   :  { %v2492_v16 = vmul.f32 0.03125, %v2488_v60 }
0x13cf   :  { %v2494_v57 = vsub.f32 %v2484_v58, %v2492_v16  ;;  %v2491_v19 = vpop.xlane.xlu0 %2490  ;;  %v3410_v16 = vld [vmem:[#allocation10 + $0x10] sm:$0xff] }
0x13d0   :  { %v2493_v48 = vmul.f32 0.03125, %v2491_v19  ;;  %v3416_v19 = vld [vmem:[#allocation12] sm:$0xff] }
0x13d1   :  { %v2496_v56 = vmul.f32 %v2494_v57, %v2494_v57 }
0x13d2   :  { %v2495_v20 = vsub.f32 %v2485_v36, %v2493_v48 }
0x13d3   :  { %v2498_v40 = vsel %vm157_vm0, %v2496_v56, 0.0 }
0x13d4   :  { %2499 = vadd.xlane.f32.xlu0 %v2498_v40  ;;  %v2497_v4 = vmul.f32 %v2495_v20, %v2495_v20 }
0x13d6   :  { %v2501_v21 = vsel %vm157_vm0, %v2497_v4, 0.0 }
0x13d7   :  { %2502 = vadd.xlane.f32.xlu1 %v2501_v21 }
0x13e8   :  { %2550 = vrot.lane.b32.xlu1 %v4013_v14, %s3594_s10 }
0x13ea   :  { %2552 = vrot.lane.b32.xlu0 %v4011_v27, %s3594_s10 }
0x13ec   :  { %2548 = vrot.lane.b32.xlu1 %v4017_v61, %s3594_s10 }
0x13f0   :  { %2546 = vrot.lane.b32.xlu1 %v4021_v3, %s3594_s10  ;;  %v2515_v3 = vrot.slane %v4027_v45, %v3757_v23 }
0x145d   :  { %v2500_v22 = vpop.xlane.xlu0 %2499 }
0x145e   :  { %v2504_v24 = vmul.f32 0.03125, %v2500_v22 }
0x1460   :  { %v2506_v28 = vadd.f32 1e-05, %v2504_v24  ;;  %v2503_v34 = vpop.xlane.xlu1 %2502 }
0x1461   :  { %v2553_v1 = vpop.permute.xlu0 %2552  ;;  %v2505_v6 = vmul.f32 0.03125, %v2503_v34 }
0x1462   :  { %3390 = vrsqrt.f32 %v2506_v28  ;;  %3273 = vmatprep.subr.mxu1 %v2553_v1 }
0x1463   :  { %3274 = vmatpush3.msra.mxu1 %v2553_v1  ;;  %v2507_v7 = vadd.f32 1e-05, %v2505_v6  ;;  %v3417_v1 = vld [vmem:[#allocation10 + $0x18] sm:$0xff] }
0x1464   :  { %v2551_v14 = vpop.permute.xlu1 %2550  ;;  %v3418_v6 = vld [vmem:[#allocation12 + $0x38] sm:$0xff] }
0x1465   :  { %3392 = vrsqrt.f32 %v2507_v7  ;;  %3275 = vmatprep.subr.mxu1 %v2551_v14  ;;  %v3419_v7 = vld [vmem:[#allocation12 + $0x28] sm:$0xff] }
0x1466   :  { %3276 = vmatpush3.msra.mxu1 %v2551_v14  ;;  %v3420_v14 = vld [vmem:[#allocation12 + $0x18] sm:$0xff] }
0x1468   :  { %v2549_v27 = vpop.permute.xlu1 %2548 }
0x1469   :  { %3277 = vmatprep.subr.mxu1 %v2549_v27 }
0x146a   :  { %3278 = vmatpush3.msra.mxu1 %v2549_v27  ;;  %v3421_v27 = vld [vmem:[#allocation12 + $0x8] sm:$0xff] }
0x146c   :  { %v2547_v61 = vpop.permute.xlu1 %2546 }
0x146d   :  { %3279 = vmatprep.subr.mxu1 %v2547_v61 }
0x146e   :  { %3280 = vmatpush3.msra.mxu1 %v2547_v61 }
0x146f   :  { %v3391_v63 = vpop.eup %3390 }
0x1470   :  { %v2510_v10 = vmul.f32 %v3391_v63, %v2494_v57  ;;  %v3415_v57 = vld [vmem:[#allocation12 + $0x10] sm:$0xff] }
0x1472   :  { %v2516_v0 = vmul.f32 %v2515_v3, %v2510_v10  ;;  %v3393_v11 = vpop.eup %3392 }
0x1473   :  { %v2511_v15 = vmul.f32 %v3393_v11, %v2495_v20 }
0x1474   :  { %v2522_v13 = vadd.f32 %v2521_v9, %v2516_v0 }
0x1475   :  { %v2517_v12 = vmul.f32 %v2515_v3, %v2511_v15 }
0x1476   :  { %v3019_v35 = vmul.f32 -1.442695, %v2522_v13 }
0x1477   :  { %v2523_v43 = vadd.f32 %v2521_v9, %v2517_v12 }
0x1478   :  { %3394 = vpow2.f32 %v3019_v35 }
0x1479   :  { %v3020_v50 = vmul.f32 -1.442695, %v2523_v43 }
0x147b   :  { %3396 = vpow2.f32 %v3020_v50 }
0x1485   :  { %v3395_v51 = vpop.eup %3394 }
0x1486   :  { %v2530_v62 = vadd.f32 1.0, %v3395_v51 }
0x1488   :  { %3398 = vrcp.f32 %v2530_v62  ;;  %v3397_v17 = vpop.eup %3396 }
0x1489   :  { %v2531_v38 = vadd.f32 1.0, %v3397_v17 }
0x148b   :  { %3400 = vrcp.f32 %v2531_v38  ;;  %v2672_v38 = vrot.slane %v4027_v45, %v3993_v25 }
0x1495   :  { %v3399_v31 = vpop.eup %3398 }
0x1496   :  { %v2536_v53 = vmul.f32 %v3399_v31, %v2522_v13 }
0x1498   :  { %3281 = vmatprep.mubr.msk.f32.mxu1 %vm157_vm0, %v2536_v53  ;;  %v3401_v26 = vpop.eup %3400 }
0x1499   :  { %v2537_v59 = vmul.f32 %v3401_v26, %v2523_v43 }
0x149b   :  { %3282 = vmatmul.mubr.msk.f32.vlgmr.msra.gmra.mxu1 %vm157_vm0, %v2537_v59 }
0x155b   :  { %v3283_v8 = vpop.f32.mrf.mxu1 }
0x155c   :  { %v2636_v58 = vadd.f32 %v3283_v8, %v2541_v2 }
0x155d   :  { %v2630_v5 = vpop.f32.mrf.mxu1 }
0x155e   :  { %v2640_v29 = vmul.f32 %v3849_v37, %v2636_v58  ;;  %v2631_v18 = vadd.f32 %v2630_v5, %v2541_v2  ;;  %v3411_v37 = vld [vmem:[#allocation10 + $0x8] sm:$0xff]  ;;  %v2678_v2 = vrot.slane %v4043_v52, %v3701_v30 }
0x1560   :  { %v4152_v39 = vadd.f32 %v2640_v29, %v3998_v42  ;;  %v2639_v36 = vmul.f32 %v3843_v33, %v2631_v18  ;;  %v3412_v42 = vld [vmem:[#allocation10] sm:$0xff]  ;;  %v3413_v33 = vld [vmem:[#allocation12 + $0x30] sm:$0xff]  ;;  %v2684_v18 = vrot.slane %v4043_v52, %v3706_v32 }
0x1562   :  { %v4156_v54 = vadd.f32 %v2639_v36, %v4001_v49  ;;  %v2646_v60 = vsel %vm157_vm0, %v4152_v39, 0.0  ;;  %v3414_v49 = vld [vmem:[#allocation12 + $0x20] sm:$0xff] }
0x1563   :  { %2647 = vadd.xlane.f32.xlu1 %v2646_v60 }
0x1564   :  { %v2643_v41 = vsel %vm157_vm0, %v4156_v54, 0.0 }
0x1565   :  { %2644 = vadd.xlane.f32.xlu0 %v2643_v41 }
0x1574   :  { %2693 = vrot.lane.b32.xlu1 %v3410_v16, %s3594_s10 }
0x1578   :  { %2691 = vrot.lane.b32.xlu1 %v3411_v37, %s3594_s10 }
0x157c   :  { %2689 = vrot.lane.b32.xlu1 %v3412_v42, %s3594_s10  ;;  %v2787_v42 = vrot.slane %v4043_v52, %v3715_v47 }
0x1580   :  { %2808 = vrot.lane.b32.xlu1 %v3413_v33, %s3593_s5 }
0x1584   :  { %2804 = vrot.lane.b32.xlu1 %v3414_v49, %s3593_s5 }
0x1588   :  { %2800 = vrot.lane.b32.xlu1 %v3415_v57, %s3593_s5 }
0x158c   :  { %2796 = vrot.lane.b32.xlu1 %v3416_v19, %s3593_s5 }
0x15ec   :  { %v2648_v48 = vpop.xlane.xlu1 %2647 }
0x15ed   :  { %v2650_v56 = vmul.f32 0.03125, %v2648_v48 }
0x15ee   :  { %v2645_v20 = vpop.xlane.xlu0 %2644 }
0x15ef   :  { %v2652_v40 = vsub.f32 %v4152_v39, %v2650_v56  ;;  %v2649_v4 = vmul.f32 0.03125, %v2645_v20 }
0x15f0   :  { %v2694_v61 = vpop.permute.xlu1 %2693 }
0x15f1   :  { %v2651_v21 = vsub.f32 %v4156_v54, %v2649_v4  ;;  %v2654_v22 = vmul.f32 %v2652_v40, %v2652_v40 }
0x15f3   :  { %v2658_v24 = vsel %vm157_vm0, %v2654_v22, 0.0  ;;  %v2653_v28 = vmul.f32 %v2651_v21, %v2651_v21 }
0x15f4   :  { %2659 = vadd.xlane.f32.xlu0 %v2658_v24  ;;  %v2692_v63 = vpop.permute.xlu1 %2691 }
0x15f5   :  { %v2655_v34 = vsel %vm157_vm0, %v2653_v28, 0.0 }
0x15f8   :  { %2656 = vadd.xlane.f32.xlu0 %v2655_v34  ;;  %v2690_v15 = vpop.permute.xlu1 %2689 }
0x15fc   :  { %v2809_v35 = vpop.permute.xlu1 %2808 }
0x1600   :  { %v2805_v51 = vpop.permute.xlu1 %2804 }
0x1604   :  { %v2801_v29 = vpop.permute.xlu1 %2800 }
0x1608   :  { %v2797_v45 = vpop.permute.xlu1 %2796 }
0x160e   :  { %2695 = vrot.lane.b32.xlu0 %v3417_v1, %s3594_s10 }
0x1612   :  { %2810 = vrot.lane.b32.xlu0 %v3418_v6, %s3593_s5 }
0x1616   :  { %2806 = vrot.lane.b32.xlu0 %v3419_v7, %s3593_s5 }
0x161a   :  { %2802 = vrot.lane.b32.xlu0 %v3420_v14, %s3593_s5 }
0x161e   :  { %2798 = vrot.lane.b32.xlu0 %v3421_v27, %s3593_s5 }
0x167d   :  { %v2660_v3 = vpop.xlane.xlu0 %2659 }
0x167e   :  { %v2662_v10 = vmul.f32 0.03125, %v2660_v3 }
0x1680   :  { %v2664_v9 = vadd.f32 1e-05, %v2662_v10  ;;  %v2934_v10 = vrot.slane %v4043_v52, %v3722_v55 }
0x1681   :  { %v2657_v0 = vpop.xlane.xlu0 %2656 }
0x1682   :  { %3402 = vrsqrt.f32 %v2664_v9  ;;  %v2661_v11 = vmul.f32 0.03125, %v2657_v0 }
0x1684   :  { %v2663_v13 = vadd.f32 1e-05, %v2661_v11  ;;  %v2940_v11 = vrot.slane %v4043_v52, %v3757_v23 }
0x1685   :  { %v2696_v12 = vpop.permute.xlu0 %2695 }
0x1686   :  { %3404 = vrsqrt.f32 %v2663_v13  ;;  %3284 = vmatprep.subr.mxu0 %v2696_v12 }
0x1687   :  { %3285 = vmatpush3.msra.mxu0 %v2696_v12 }
0x1688   :  { %3286 = vmatprep.subr.mxu0 %v2694_v61 }
0x1689   :  { %3287 = vmatpush3.msra.mxu0 %v2694_v61  ;;  %v2811_v43 = vpop.permute.xlu0 %2810 }
0x168a   :  { %3288 = vmatprep.subr.mxu0 %v2692_v63  ;;  %3295 = vmatprep.subr.mxu1 %v2811_v43 }
0x168b   :  { %3289 = vmatpush3.msra.mxu0 %v2692_v63  ;;  %3296 = vmatpush3.msra.mxu1 %v2811_v43 }
0x168c   :  { %3290 = vmatprep.subr.mxu0 %v2690_v15  ;;  %3297 = vmatprep.subr.mxu1 %v2809_v35 }
0x168d   :  { %3291 = vmatpush3.msra.mxu0 %v2690_v15  ;;  %3298 = vmatpush3.msra.mxu1 %v2809_v35  ;;  %v2807_v50 = vpop.permute.xlu0 %2806 }
0x168e   :  { %3299 = vmatprep.subr.mxu1 %v2807_v50 }
0x168f   :  { %v3403_v62 = vpop.eup %3402  ;;  %3300 = vmatpush3.msra.mxu1 %v2807_v50 }
0x1690   :  { %3301 = vmatprep.subr.mxu1 %v2805_v51  ;;  %v2668_v17 = vmul.f32 %v3403_v62, %v2652_v40 }
0x1691   :  { %3302 = vmatpush3.msra.mxu1 %v2805_v51  ;;  %v2803_v31 = vpop.permute.xlu0 %2802 }
0x1692   :  { %3303 = vmatprep.subr.mxu1 %v2803_v31  ;;  %v2674_v59 = vmul.f32 %v2672_v38, %v2668_v17 }
0x1693   :  { %v3405_v53 = vpop.eup %3404  ;;  %3304 = vmatpush3.msra.mxu1 %v2803_v31 }
0x1694   :  { %v2667_v26 = vmul.f32 %v3405_v53, %v2651_v21  ;;  %v2680_v5 = vadd.f32 %v2678_v2, %v2674_v59  ;;  %3305 = vmatprep.subr.mxu1 %v2801_v29 }
0x1695   :  { %3306 = vmatpush3.msra.mxu1 %v2801_v29  ;;  %v2799_v25 = vpop.permute.xlu0 %2798 }
0x1696   :  { %v2673_v8 = vmul.f32 %v2672_v38, %v2667_v26  ;;  %3307 = vmatprep.subr.mxu1 %v2799_v25 }
0x1697   :  { %3308 = vmatpush3.msra.mxu1 %v2799_v25 }
0x1698   :  { %v2679_v58 = vadd.f32 %v2678_v2, %v2673_v8  ;;  %3309 = vmatprep.subr.mxu1 %v2797_v45 }
0x1699   :  { %3310 = vmatpush3.msra.mxu1 %v2797_v45 }
0x169a   :  { %3292 = vmatprep.mubr.msk.f32.mxu0 %vm157_vm0, %v2679_v58 }
0x169b   :  { %3293 = vmatmul.mubr.msk.f32.vlgmr.msra.gmra.mxu0 %vm157_vm0, %v2680_v5 }
0x175b   :  { %v3294_v30 = vpop.f32.mrf.mxu0 }
0x175c   :  { %v2779_v36 = vadd.f32 %v3294_v30, %v2684_v18 }
0x175d   :  { %v2773_v60 = vpop.f32.mrf.mxu0 }
0x175e   :  { %v2774_v41 = vadd.f32 %v2773_v60, %v2684_v18  ;;  %v2783_v37 = vmax.f32 %v2779_v36, 0.0 }
0x1760   :  { %v2782_v16 = vmax.f32 %v2774_v41, 0.0 }
0x1762   :  { %3311 = vmatprep.mubr.msk.f32.mxu1 %vm288_vm1, %v2782_v16 }
0x1763   :  { %3312 = vmatmul.mubr.msk.f32.vlgmr.msra.gmra.mxu1 %vm288_vm1, %v2783_v37  ;;  %vm2945_vm1 = vcmask 785408  }
0x1823   :  { %v3313_v33 = vpop.f32.mrf.mxu1 }
0x1824   :  { %v2898_v49 = vadd.f32 %v3313_v33, %v2787_v42 }
0x1825   :  { %v2892_v57 = vpop.f32.mrf.mxu1 }
0x1826   :  { %v2902_v19 = vmul.f32 0.5, %v2898_v49  ;;  %v2893_v48 = vadd.f32 %v2892_v57, %v2787_v42 }
0x1828   :  { %v2901_v56 = vmul.f32 0.5, %v2893_v48  ;;  %v2904_v32 = vadd.f32 %v2902_v19, %v4152_v39 }
0x182a   :  { %v2908_v20 = vsel %vm157_vm0, %v2904_v32, 0.0  ;;  %v2903_v40 = vadd.f32 %v2901_v56, %v4156_v54 }
0x182b   :  { %2909 = vadd.xlane.f32.xlu1 %v2908_v20 }
0x182c   :  { %v2905_v4 = vsel %vm157_vm0, %v2903_v40, 0.0 }
0x182d   :  { %2906 = vadd.xlane.f32.xlu0 %v2905_v4 }
0x18b4   :  { %v2910_v21 = vpop.xlane.xlu1 %2909 }
0x18b5   :  { %v2912_v22 = vmul.f32 0.03125, %v2910_v21 }
0x18b6   :  { %v2907_v24 = vpop.xlane.xlu0 %2906 }
0x18b7   :  { %v2911_v47 = vmul.f32 0.03125, %v2907_v24  ;;  %v2914_v28 = vsub.f32 %v2904_v32, %v2912_v22 }
0x18b9   :  { %v2913_v34 = vsub.f32 %v2903_v40, %v2911_v47  ;;  %v2916_v7 = vmul.f32 %v2914_v28, %v2914_v28 }
0x18bb   :  { %v2915_v1 = vmul.f32 %v2913_v34, %v2913_v34  ;;  %v2920_v39 = vsel %vm157_vm0, %v2916_v7, 0.0 }
0x18bd   :  { %v2917_v6 = vsel %vm157_vm0, %v2915_v1, 0.0 }
0x18be   :  { %2918 = vadd.xlane.f32.xlu0 %v2917_v6 }
0x18c2   :  { %2921 = vadd.xlane.f32.xlu0 %v2920_v39 }
0x1947   :  { %v2919_v14 = vpop.xlane.xlu0 %2918 }
0x1948   :  { %v2923_v54 = vmul.f32 0.03125, %v2919_v14 }
0x194a   :  { %v2925_v27 = vadd.f32 1e-05, %v2923_v54 }
0x194b   :  { %v2922_v61 = vpop.xlane.xlu0 %2921 }
0x194c   :  { %3406 = vrsqrt.f32 %v2925_v27  ;;  %v2924_v3 = vmul.f32 0.03125, %v2922_v61 }
0x194e   :  { %v2926_v63 = vadd.f32 1e-05, %v2924_v3 }
0x1950   :  { %3408 = vrsqrt.f32 %v2926_v63 }
0x1959   :  { %v3407_v9 = vpop.eup %3406 }
0x195a   :  { %v2929_v0 = vmul.f32 %v3407_v9, %v2913_v34 }
0x195c   :  { %v2935_v15 = vmul.f32 %v2934_v10, %v2929_v0 }
0x195d   :  { %v3409_v13 = vpop.eup %3408 }
0x195e   :  { %v2930_v12 = vmul.f32 %v3409_v13, %v2914_v28  ;;  %v2941_v35 = vadd.f32 %v2940_v11, %v2935_v15 }
0x1960   :  { %v2936_v43 = vmul.f32 %v2934_v10, %v2930_v12  ;;  %v2943_v50 = vsel %vm157_vm0, %v2941_v35, %v3781_v46 }
0x1961   :  { %2946 = vst.msk [vmem:[#allocation15] sm:$0xff] %vm2945_vm1, %v2943_v50 }
0x1962   :  { %v2942_v51 = vadd.f32 %v2940_v11, %v2936_v43 }
0x1964   :  { %v2944_v55 = vsel %vm157_vm0, %v2942_v51, %v3779_v44 }
0x1965   :  { %2947 = vst.msk [vmem:[#allocation15 + $0x8] sm:$0xff] %vm2945_vm1, %v2944_v55 }
0x1966   :  { %3561 = shalt.err (!%p3558_p6)
}
0x1967   :  { %2959 = dma.vmem_to_hbm [thread:$0]  %s2954_s4, 256, %s4217_s7, [#allocation6], %s3585_s0, %s3585_s0, %s3586_s9  }
0x1968   :  { %3580 = dma.done.wait [#allocation6], 256  }
0x1969   :  { %3581 = vsyncadd [#allocation6], 4294967040 }
0x196a   :  { %2963 = vsyncpa [#allocation5], 1 }
0x196b   :  { %2964 = vsyncpa [#allocation8], 1 }
0x196c   :  { %2965 = vsyncpa [#allocation11], 1 }
0x196d   :  { %2966 = vsyncpa [#allocation14], 1 }
0x196e   :  { %2967 = vsyncpa [#allocation6], 1 }

</bundles_post_ra>
